<compile_context>
chip_gen: v5e
topology: v5e:2x2
jax: 0.10.0
libtpu: 0.0.40
codegen_flags: <defaults>
</compile_context>

<pallas_src>
import functools

import jax
import jax.numpy as jnp
from jax import lax
from jax.experimental import pallas as pl
from jax.experimental.pallas import tpu as pltpu


def _cross_attn_kernel(q_ref, k_ref, wq_ref, bqc_ref, wkt_ref, bkr_ref, o_ref,
                       kp_s, *, chunk_rows):
    f32 = jnp.float32
    tb = kp_s.shape[0]
    r_rows = chunk_rows
    n_chunks = tb // r_rows

    # k projection for the whole batch tile: one big MXU matmul, f32 accumulate,
    # operands kept in their native dtype (no VPU casts).
    kp_s[...] = jnp.dot(k_ref[...], wkt_ref[...],
                        preferred_element_type=f32) + bkr_ref[...]

    def chunk_body(c, carry):
        j0 = pl.multiple_of(c * r_rows, r_rows)

        # q projection for this chunk, produced directly in column-major (D, R)
        # form via rhs-contraction (== trans_b), so no in-kernel transposes:
        #   qcols[i, r] = sum_c Wq[i, c] * q[j0+r, c] + bq[i]
        q_rows = q_ref[pl.ds(j0, r_rows), :]                         # (R, D) raw q rows
        qcols = lax.dot_general(wq_ref[...], q_rows,
                                (((1,), (1,)), ((), ())),
                                preferred_element_type=f32) + bqc_ref[...]   # (D, R)

        krows = kp_s[pl.ds(j0, r_rows), :]                           # (R, D) projected k rows
        kmax = jnp.max(krows, axis=-1, keepdims=True)                # (R, 1)
        kmin = jnp.min(krows, axis=-1, keepdims=True)                # (R, 1)

        slabs = []
        for r in range(r_rows):                                      # fully unrolled, static slices
            qcol = qcols[:, r:r + 1]                                 # (D, 1) static lane slice
            krow = krows[r:r + 1, :]                                 # (1, D) static sublane slice
            # Analytic row max: max_j qcol*krow[j] = qcol*max(krow) if qcol>=0 else qcol*min(krow)
            m = qcol * jnp.where(qcol >= 0.0, kmax[r:r + 1, :], kmin[r:r + 1, :])   # (D, 1)
            p = jnp.exp(qcol * krow - m)                             # (D, D), exact max -> no overflow
            inv = 1.0 / jnp.sum(p, axis=-1, keepdims=True)           # exact reciprocal (softmax parity)
            slabs.append(p * inv)
        chunk = jnp.stack(slabs, axis=0)                             # (R, D, D)
        o_ref[pl.ds(j0, r_rows)] = chunk.astype(o_ref.dtype)         # one contiguous chunk store
        return carry

    lax.fori_loop(0, n_chunks, chunk_body, 0,
                  unroll=True if n_chunks <= 8 else 4)


def _vmem_capacity_bytes():
    try:
        info = pltpu.get_tpu_info()
        cap = getattr(info, "vmem_capacity_bytes", None)
        if cap:
            return int(cap)
    except Exception:
        pass
    return 64 * 1024 * 1024      # conservative fallback (v7x per-TensorCore VMEM)


def _pick_batch_tile(batch, dim, vmem_cap):
    """Rows per grid step, sized from the real per-generation VMEM capacity."""
    itemsize = 4
    # Per-row cost: double-buffered (dim,dim) output block + double-buffered q/k
    # input rows + the kp f32 scratch row.
    per_row = (2 * dim * dim + 4 * dim + dim) * itemsize
    # Fixed cost: resident weights/biases (conservatively counted as double
    # buffered) + in-flight chunk slabs (a few (8, dim, dim) f32 temporaries).
    fixed = (4 * (dim * dim + dim) + 32 * dim * dim) * itemsize
    budget = max(0, int(vmem_cap * 0.6) - fixed)
    cap_rows = max(1, budget // per_row)
    tb = min(batch, cap_rows, 512)        # 512: ~85% of HBM write roofline, diminishing returns past it
    if batch > 256:
        tb = min(tb, (batch + 1) // 2)    # >=2 grid steps so "parallel" shards across v7x's 2 TCs
    if tb < batch:
        tb = max(8, (tb // 8) * 8)        # sublane-aligned blocks when actually tiling the batch
    # TODO(synk): for very large dim (>~512) the D axis of the output should be tiled as well.
    return int(max(1, tb))


def _pick_chunk_rows(tb):
    for r in (8, 4, 2, 1):
        if tb % r == 0:
            return r
    return 1


def cross_attention_forward(q, k, v, wq, bq, wk, bk, wv, bv):
    """Pallas CrossAttention.forward -> (B, dim, dim) attention weights."""
    B, D = q.shape
    assert k.shape == (B, D)
    # The v projection never reaches the returned attention weights; skip dead compute.
    del v, wv, bv

    vmem_cap = _vmem_capacity_bytes()
    tb = _pick_batch_tile(B, D, vmem_cap)
    n_steps = pl.cdiv(B, tb)
    chunk_rows = _pick_chunk_rows(tb)

    wk_t = jnp.transpose(wk)              # (in, out): kp = k @ wk_t + bk
    bq_col = bq.reshape(D, 1)             # column bias for the (D, R) q columns
    bk_row = bk.reshape(1, D)

    kernel = functools.partial(_cross_attn_kernel, chunk_rows=chunk_rows)

    out = pl.pallas_call(
        kernel,
        out_shape=jax.ShapeDtypeStruct((B, D, D), q.dtype),
        grid_spec=pltpu.PrefetchScalarGridSpec(
            num_scalar_prefetch=0,
            grid=(n_steps,),
            in_specs=[
                pl.BlockSpec((tb, D), lambda i: (i, 0)),   # q batch tile (row-major)
                pl.BlockSpec((tb, D), lambda i: (i, 0)),   # k batch tile
                pl.BlockSpec((D, D), lambda i: (0, 0)),    # Wq (out, in) — VMEM-resident
                pl.BlockSpec((D, 1), lambda i: (0, 0)),    # bq column    — resident
                pl.BlockSpec((D, D), lambda i: (0, 0)),    # Wk^T (in, out) — resident
                pl.BlockSpec((1, D), lambda i: (0, 0)),    # bk row       — resident
            ],
            out_specs=pl.BlockSpec((tb, D, D), lambda i: (i, 0, 0)),
            scratch_shapes=[pltpu.VMEM((tb, D), jnp.float32)],   # projected k tile
        ),
        compiler_params=pltpu.CompilerParams(
            dimension_semantics=("parallel",),
            vmem_limit_bytes=int(vmem_cap * 3 // 4),   # 48 MiB on v7x, 96 MiB on v5e/v6e
        ),
    )(q, k, wq, bq_col, wk_t, bk_row)
    return out


if __name__ == "__main__":
    B, D = 4, 64   # dim=64 is the module default

    key = jax.random.PRNGKey(0)
    kq, kk, kv, kwq, kbq, kwk, kbk, kwv, kbv = jax.random.split(key, 9)
    q = jax.random.normal(kq, (B, D), jnp.float32)
    k = jax.random.normal(kk, (B, D), jnp.float32)
    v = jax.random.normal(kv, (B, D), jnp.float32)

    bound = 1.0 / (D ** 0.5)   # nn.Linear default init range
    wq = jax.random.uniform(kwq, (D, D), jnp.float32, -bound, bound)
    bq = jax.random.uniform(kbq, (D,), jnp.float32, -bound, bound)
    wk = jax.random.uniform(kwk, (D, D), jnp.float32, -bound, bound)
    bk = jax.random.uniform(kbk, (D,), jnp.float32, -bound, bound)
    wv = jax.random.uniform(kwv, (D, D), jnp.float32, -bound, bound)
    bv = jax.random.uniform(kbv, (D,), jnp.float32, -bound, bound)

    attn = cross_attention_forward(q, k, v, wq, bq, wk, bk, wv, bv)
    attn = jax.block_until_ready(attn)

    # Pure-JAX reference of the same semantics (high-precision matmuls).
    qp = jnp.dot(q, wq.T, precision=lax.Precision.HIGHEST) + bq
    kp = jnp.dot(k, wk.T, precision=lax.Precision.HIGHEST) + bk
    s = qp[:, :, None] * kp[:, None, :]
    ref = jax.nn.softmax(s, axis=-1)

    assert attn.shape == (B, D, D)
    err = float(jnp.max(jnp.abs(attn - ref)))
    assert err < 2e-3, f"max abs error {err}"
    print("KERNEL_OK")
</pallas_src>

<mosaic_0001>
module attributes {stable_mosaic.version = 11 : i64} {
  func.func @_cross_attn_kernel(%arg0: i32, %arg1: memref<4x64xf32, #tpu.memory_space<vmem>>, %arg2: memref<4x64xf32, #tpu.memory_space<vmem>>, %arg3: memref<64x64xf32, #tpu.memory_space<vmem>>, %arg4: memref<64x1xf32, #tpu.memory_space<vmem>>, %arg5: memref<64x64xf32, #tpu.memory_space<vmem>>, %arg6: memref<1x64xf32, #tpu.memory_space<vmem>>, %arg7: memref<4x64x64xf32, #tpu.memory_space<vmem>>, %arg8: memref<4x64xf32, #tpu.memory_space<vmem>>) attributes {dimension_semantics = [#tpu.dimension_semantics<parallel>], iteration_bounds = array<i64: 1>, scalar_prefetch = 0 : i64, scratch_operands = 1 : i64, tpu.core_type = #tpu.core_type<tc>, window_params = [{transform_indices = @transform_0, window_bounds = array<i64: 4, 64>}, {transform_indices = @transform_1, window_bounds = array<i64: 4, 64>}, {pipeline_mode = #tpu.pipeline_mode<synchronous>, transform_indices = @transform_2, window_bounds = array<i64: 64, 64>}, {pipeline_mode = #tpu.pipeline_mode<synchronous>, transform_indices = @transform_3, window_bounds = array<i64: 64, 1>}, {pipeline_mode = #tpu.pipeline_mode<synchronous>, transform_indices = @transform_4, window_bounds = array<i64: 64, 64>}, {pipeline_mode = #tpu.pipeline_mode<synchronous>, transform_indices = @transform_5, window_bounds = array<i64: 1, 64>}, {transform_indices = @transform_6, window_bounds = array<i64: 4, 64, 64>}]} {
    %c0 = arith.constant 0 : index
    %c0_0 = arith.constant 0 : index
    %0 = vector.load %arg2[%c0, %c0_0] : memref<4x64xf32, #tpu.memory_space<vmem>>, vector<4x64xf32>
    %c0_1 = arith.constant 0 : index
    %c0_2 = arith.constant 0 : index
    %1 = vector.load %arg5[%c0_1, %c0_2] : memref<64x64xf32, #tpu.memory_space<vmem>>, vector<64x64xf32>
    %cst = arith.constant dense<0.000000e+00> : vector<4x64xf32>
    %2 = tpu.matmul %0, %1, %cst {dimension_numbers = #tpu.dot_dimension_numbers<[1], [0], [0], [1], [0, 0, 1, 1], [], []>} : vector<4x64xf32>, vector<64x64xf32>, vector<4x64xf32> -> vector<4x64xf32>
    %c0_3 = arith.constant 0 : index
    %c0_4 = arith.constant 0 : index
    %3 = vector.load %arg6[%c0_3, %c0_4] : memref<1x64xf32, #tpu.memory_space<vmem>>, vector<1x64xf32>
    %4 = vector.broadcast %3 : vector<1x64xf32> to vector<4x64xf32>
    %5 = arith.addf %2, %4 : vector<4x64xf32>
    %c0_5 = arith.constant 0 : index
    %c0_6 = arith.constant 0 : index
    %6 = vector.load %arg8[%c0_5, %c0_6] : memref<4x64xf32, #tpu.memory_space<vmem>>, vector<4x64xf32>
    tpu.vector_store %arg8[%c0_5, %c0_6], %5 {strides = array<i32>} : memref<4x64xf32, #tpu.memory_space<vmem>>, vector<4x64xf32>,
    %c0_i32 = arith.constant 0 : i32
    %c4_i32 = arith.constant 4 : i32
    %7 = arith.muli %c0_i32, %c4_i32 : i32
    %8 = tpu.assume_multiple %7, 4 : i32
    %9 = arith.index_cast %8 : i32 to index
    %c0_7 = arith.constant 0 : index
    %10 = vector.load %arg1[%9, %c0_7] : memref<4x64xf32, #tpu.memory_space<vmem>>, vector<4x64xf32>
    %c0_8 = arith.constant 0 : index
    %c0_9 = arith.constant 0 : index
    %11 = vector.load %arg3[%c0_8, %c0_9] : memref<64x64xf32, #tpu.memory_space<vmem>>, vector<64x64xf32>
    %cst_10 = arith.constant dense<0.000000e+00> : vector<64x4xf32>
    %12 = tpu.matmul %11, %10, %cst_10 {dimension_numbers = #tpu.dot_dimension_numbers<[1], [1], [0], [0], [0, 0, 1, 0], [], []>} : vector<64x64xf32>, vector<4x64xf32>, vector<64x4xf32> -> vector<64x4xf32>
    %c0_11 = arith.constant 0 : index
    %c0_12 = arith.constant 0 : index
    %13 = vector.load %arg4[%c0_11, %c0_12] : memref<64x1xf32, #tpu.memory_space<vmem>>, vector<64x1xf32>
    %14 = vector.broadcast %13 : vector<64x1xf32> to vector<64x4xf32>
    %15 = arith.addf %12, %14 : vector<64x4xf32>
    %16 = arith.index_cast %8 : i32 to index
    %c0_13 = arith.constant 0 : index
    %17 = vector.load %arg8[%16, %c0_13] : memref<4x64xf32, #tpu.memory_space<vmem>>, vector<4x64xf32>
    %cst_14 = arith.constant dense<0xFF800000> : vector<4xf32>
    %18 = vector.multi_reduction <maximumf>, %17, %cst_14 [1] : vector<4x64xf32> to vector<4xf32>
    %19 = vector.shape_cast %18 : vector<4xf32> to vector<4x1xf32>
    %cst_15 = arith.constant dense<0x7F800000> : vector<4xf32>
    %20 = vector.multi_reduction <minimumf>, %17, %cst_15 [1] : vector<4x64xf32> to vector<4xf32>
    %21 = vector.shape_cast %20 : vector<4xf32> to vector<4x1xf32>
    %22 = vector.extract_strided_slice %15 {offsets = [0, 0], sizes = [64, 1], strides = [1, 1]} : vector<64x4xf32> to vector<64x1xf32>
    %23 = vector.extract_strided_slice %17 {offsets = [0, 0], sizes = [1, 64], strides = [1, 1]} : vector<4x64xf32> to vector<1x64xf32>
    %cst_16 = arith.constant 0.000000e+00 : f32
    %24 = vector.broadcast %cst_16 : f32 to vector<64x1xf32>
    %25 = arith.cmpf oge, %22, %24 : vector<64x1xf32>
    %26 = vector.extract_strided_slice %19 {offsets = [0, 0], sizes = [1, 1], strides = [1, 1]} : vector<4x1xf32> to vector<1x1xf32>
    %27 = vector.extract_strided_slice %21 {offsets = [0, 0], sizes = [1, 1], strides = [1, 1]} : vector<4x1xf32> to vector<1x1xf32>
    %28 = vector.shape_cast %26 : vector<1x1xf32> to vector<1x1xf32>
    %29 = vector.broadcast %28 : vector<1x1xf32> to vector<64x1xf32>
    %30 = vector.shape_cast %27 : vector<1x1xf32> to vector<1x1xf32>
    %31 = vector.broadcast %30 : vector<1x1xf32> to vector<64x1xf32>
    %32 = arith.select %25, %29, %31 : vector<64x1xi1>, vector<64x1xf32>
    %33 = arith.mulf %22, %32 : vector<64x1xf32>
    %34 = vector.broadcast %22 : vector<64x1xf32> to vector<64x64xf32>
    %35 = vector.broadcast %23 : vector<1x64xf32> to vector<64x64xf32>
    %36 = arith.mulf %34, %35 : vector<64x64xf32>
    %37 = vector.broadcast %33 : vector<64x1xf32> to vector<64x64xf32>
    %38 = arith.subf %36, %37 : vector<64x64xf32>
    %39 = math.exp %38 : vector<64x64xf32>
    %cst_17 = arith.constant dense<0.000000e+00> : vector<64xf32>
    %40 = vector.multi_reduction <add>, %39, %cst_17 [1] : vector<64x64xf32> to vector<64xf32>
    %41 = vector.shape_cast %40 : vector<64xf32> to vector<64x1xf32>
    %cst_18 = arith.constant 1.000000e+00 : f32
    %42 = vector.broadcast %cst_18 : f32 to vector<64x1xf32>
    %43 = arith.divf %42, %41 : vector<64x1xf32>
    %44 = vector.broadcast %43 : vector<64x1xf32> to vector<64x64xf32>
    %45 = arith.mulf %39, %44 : vector<64x64xf32>
    %46 = vector.extract_strided_slice %15 {offsets = [0, 1], sizes = [64, 1], strides = [1, 1]} : vector<64x4xf32> to vector<64x1xf32>
    %47 = vector.extract_strided_slice %17 {offsets = [1, 0], sizes = [1, 64], strides = [1, 1]} : vector<4x64xf32> to vector<1x64xf32>
    %cst_19 = arith.constant 0.000000e+00 : f32
    %48 = vector.broadcast %cst_19 : f32 to vector<64x1xf32>
    %49 = arith.cmpf oge, %46, %48 : vector<64x1xf32>
    %50 = vector.extract_strided_slice %19 {offsets = [1, 0], sizes = [1, 1], strides = [1, 1]} : vector<4x1xf32> to vector<1x1xf32>
    %51 = vector.extract_strided_slice %21 {offsets = [1, 0], sizes = [1, 1], strides = [1, 1]} : vector<4x1xf32> to vector<1x1xf32>
    %52 = vector.shape_cast %50 : vector<1x1xf32> to vector<1x1xf32>
    %53 = vector.broadcast %52 : vector<1x1xf32> to vector<64x1xf32>
    %54 = vector.shape_cast %51 : vector<1x1xf32> to vector<1x1xf32>
    %55 = vector.broadcast %54 : vector<1x1xf32> to vector<64x1xf32>
    %56 = arith.select %49, %53, %55 : vector<64x1xi1>, vector<64x1xf32>
    %57 = arith.mulf %46, %56 : vector<64x1xf32>
    %58 = vector.broadcast %46 : vector<64x1xf32> to vector<64x64xf32>
    %59 = vector.broadcast %47 : vector<1x64xf32> to vector<64x64xf32>
    %60 = arith.mulf %58, %59 : vector<64x64xf32>
    %61 = vector.broadcast %57 : vector<64x1xf32> to vector<64x64xf32>
    %62 = arith.subf %60, %61 : vector<64x64xf32>
    %63 = math.exp %62 : vector<64x64xf32>
    %cst_20 = arith.constant dense<0.000000e+00> : vector<64xf32>
    %64 = vector.multi_reduction <add>, %63, %cst_20 [1] : vector<64x64xf32> to vector<64xf32>
    %65 = vector.shape_cast %64 : vector<64xf32> to vector<64x1xf32>
    %cst_21 = arith.constant 1.000000e+00 : f32
    %66 = vector.broadcast %cst_21 : f32 to vector<64x1xf32>
    %67 = arith.divf %66, %65 : vector<64x1xf32>
    %68 = vector.broadcast %67 : vector<64x1xf32> to vector<64x64xf32>
    %69 = arith.mulf %63, %68 : vector<64x64xf32>
    %70 = vector.extract_strided_slice %15 {offsets = [0, 2], sizes = [64, 1], strides = [1, 1]} : vector<64x4xf32> to vector<64x1xf32>
    %71 = vector.extract_strided_slice %17 {offsets = [2, 0], sizes = [1, 64], strides = [1, 1]} : vector<4x64xf32> to vector<1x64xf32>
    %cst_22 = arith.constant 0.000000e+00 : f32
    %72 = vector.broadcast %cst_22 : f32 to vector<64x1xf32>
    %73 = arith.cmpf oge, %70, %72 : vector<64x1xf32>
    %74 = vector.extract_strided_slice %19 {offsets = [2, 0], sizes = [1, 1], strides = [1, 1]} : vector<4x1xf32> to vector<1x1xf32>
    %75 = vector.extract_strided_slice %21 {offsets = [2, 0], sizes = [1, 1], strides = [1, 1]} : vector<4x1xf32> to vector<1x1xf32>
    %76 = vector.shape_cast %74 : vector<1x1xf32> to vector<1x1xf32>
    %77 = vector.broadcast %76 : vector<1x1xf32> to vector<64x1xf32>
    %78 = vector.shape_cast %75 : vector<1x1xf32> to vector<1x1xf32>
    %79 = vector.broadcast %78 : vector<1x1xf32> to vector<64x1xf32>
    %80 = arith.select %73, %77, %79 : vector<64x1xi1>, vector<64x1xf32>
    %81 = arith.mulf %70, %80 : vector<64x1xf32>
    %82 = vector.broadcast %70 : vector<64x1xf32> to vector<64x64xf32>
    %83 = vector.broadcast %71 : vector<1x64xf32> to vector<64x64xf32>
    %84 = arith.mulf %82, %83 : vector<64x64xf32>
    %85 = vector.broadcast %81 : vector<64x1xf32> to vector<64x64xf32>
    %86 = arith.subf %84, %85 : vector<64x64xf32>
    %87 = math.exp %86 : vector<64x64xf32>
    %cst_23 = arith.constant dense<0.000000e+00> : vector<64xf32>
    %88 = vector.multi_reduction <add>, %87, %cst_23 [1] : vector<64x64xf32> to vector<64xf32>
    %89 = vector.shape_cast %88 : vector<64xf32> to vector<64x1xf32>
    %cst_24 = arith.constant 1.000000e+00 : f32
    %90 = vector.broadcast %cst_24 : f32 to vector<64x1xf32>
    %91 = arith.divf %90, %89 : vector<64x1xf32>
    %92 = vector.broadcast %91 : vector<64x1xf32> to vector<64x64xf32>
    %93 = arith.mulf %87, %92 : vector<64x64xf32>
    %94 = vector.extract_strided_slice %15 {offsets = [0, 3], sizes = [64, 1], strides = [1, 1]} : vector<64x4xf32> to vector<64x1xf32>
    %95 = vector.extract_strided_slice %17 {offsets = [3, 0], sizes = [1, 64], strides = [1, 1]} : vector<4x64xf32> to vector<1x64xf32>
    %cst_25 = arith.constant 0.000000e+00 : f32
    %96 = vector.broadcast %cst_25 : f32 to vector<64x1xf32>
    %97 = arith.cmpf oge, %94, %96 : vector<64x1xf32>
    %98 = vector.extract_strided_slice %19 {offsets = [3, 0], sizes = [1, 1], strides = [1, 1]} : vector<4x1xf32> to vector<1x1xf32>
    %99 = vector.extract_strided_slice %21 {offsets = [3, 0], sizes = [1, 1], strides = [1, 1]} : vector<4x1xf32> to vector<1x1xf32>
    %100 = vector.shape_cast %98 : vector<1x1xf32> to vector<1x1xf32>
    %101 = vector.broadcast %100 : vector<1x1xf32> to vector<64x1xf32>
    %102 = vector.shape_cast %99 : vector<1x1xf32> to vector<1x1xf32>
    %103 = vector.broadcast %102 : vector<1x1xf32> to vector<64x1xf32>
    %104 = arith.select %97, %101, %103 : vector<64x1xi1>, vector<64x1xf32>
    %105 = arith.mulf %94, %104 : vector<64x1xf32>
    %106 = vector.broadcast %94 : vector<64x1xf32> to vector<64x64xf32>
    %107 = vector.broadcast %95 : vector<1x64xf32> to vector<64x64xf32>
    %108 = arith.mulf %106, %107 : vector<64x64xf32>
    %109 = vector.broadcast %105 : vector<64x1xf32> to vector<64x64xf32>
    %110 = arith.subf %108, %109 : vector<64x64xf32>
    %111 = math.exp %110 : vector<64x64xf32>
    %cst_26 = arith.constant dense<0.000000e+00> : vector<64xf32>
    %112 = vector.multi_reduction <add>, %111, %cst_26 [1] : vector<64x64xf32> to vector<64xf32>
    %113 = vector.shape_cast %112 : vector<64xf32> to vector<64x1xf32>
    %cst_27 = arith.constant 1.000000e+00 : f32
    %114 = vector.broadcast %cst_27 : f32 to vector<64x1xf32>
    %115 = arith.divf %114, %113 : vector<64x1xf32>
    %116 = vector.broadcast %115 : vector<64x1xf32> to vector<64x64xf32>
    %117 = arith.mulf %111, %116 : vector<64x64xf32>
    %118 = vector.shape_cast %45 : vector<64x64xf32> to vector<1x64x64xf32>
    %119 = vector.shape_cast %69 : vector<64x64xf32> to vector<1x64x64xf32>
    %120 = vector.shape_cast %93 : vector<64x64xf32> to vector<1x64x64xf32>
    %121 = vector.shape_cast %117 : vector<64x64xf32> to vector<1x64x64xf32>
    %122 = tpu.concatenate %118, %119, %120, %121 in 0 : vector<1x64x64xf32>, vector<1x64x64xf32>, vector<1x64x64xf32>, vector<1x64x64xf32> -> vector<4x64x64xf32>
    %123 = arith.index_cast %8 : i32 to index
    %c0_28 = arith.constant 0 : index
    %c0_29 = arith.constant 0 : index
    %124 = vector.load %arg7[%123, %c0_28, %c0_29] : memref<4x64x64xf32, #tpu.memory_space<vmem>>, vector<4x64x64xf32>
    tpu.vector_store %arg7[%123, %c0_28, %c0_29], %122 {strides = array<i32>} : memref<4x64x64xf32, #tpu.memory_space<vmem>>, vector<4x64x64xf32>,
    %c1_i32 = arith.constant 1 : i32
    return
  }
  func.func @transform_0(%arg0: i32) -> (i32, i32) {
    %c0_i32 = arith.constant 0 : i32
    %c0_i32_0 = arith.constant 0 : i32
    return %arg0, %c0_i32 : i32, i32
  }
  func.func @transform_1(%arg0: i32) -> (i32, i32) {
    %c0_i32 = arith.constant 0 : i32
    %c0_i32_0 = arith.constant 0 : i32
    return %arg0, %c0_i32 : i32, i32
  }
  func.func @transform_2(%arg0: i32) -> (i32, i32) {
    %c0_i32 = arith.constant 0 : i32
    %c0_i32_0 = arith.constant 0 : i32
    %c0_i32_1 = arith.constant 0 : i32
    return %c0_i32, %c0_i32_0 : i32, i32
  }
  func.func @transform_3(%arg0: i32) -> (i32, i32) {
    %c0_i32 = arith.constant 0 : i32
    %c0_i32_0 = arith.constant 0 : i32
    %c0_i32_1 = arith.constant 0 : i32
    return %c0_i32, %c0_i32_0 : i32, i32
  }
  func.func @transform_4(%arg0: i32) -> (i32, i32) {
    %c0_i32 = arith.constant 0 : i32
    %c0_i32_0 = arith.constant 0 : i32
    %c0_i32_1 = arith.constant 0 : i32
    return %c0_i32, %c0_i32_0 : i32, i32
  }
  func.func @transform_5(%arg0: i32) -> (i32, i32) {
    %c0_i32 = arith.constant 0 : i32
    %c0_i32_0 = arith.constant 0 : i32
    %c0_i32_1 = arith.constant 0 : i32
    return %c0_i32, %c0_i32_0 : i32, i32
  }
  func.func @transform_6(%arg0: i32) -> (i32, i32, i32) {
    %c0_i32 = arith.constant 0 : i32
    %c0_i32_0 = arith.constant 0 : i32
    %c0_i32_1 = arith.constant 0 : i32
    return %arg0, %c0_i32, %c0_i32_0 : i32, i32, i32
  }
}

</mosaic_0001>

<bundles_post_ra>
// kernel: tpu_custom_call.1
= control target key start
LH: loop header
LB: loop body
LE: loop exit
PB: predicated region body
PF: predicated region fallthrough
CT: control target
= control target key end

     0   :  { %11 = vsyncpa [#allocation4], 0  ;;  %s2630_s0 = inlined_call_operand.hbm [shape: f32[4,64], index: 0, kind: input, shape index: {}]   ;;  %s2631_s1 = inlined_call_operand.hbm [shape: f32[4,64], index: 1, kind: input, shape index: {}]   ;;  %s2632_s2 = inlined_call_operand.vmem [shape: f32[64,64], index: 2, kind: input, shape index: {}]   ;;  %s2633_s3 = inlined_call_operand.vmem [shape: f32[64,1], index: 3, kind: input, shape index: {}]   ;;  %s2634_s4 = inlined_call_operand.hbm [shape: f32[64,64], index: 4, kind: input, shape index: {}]   ;;  %s2635_s5 = inlined_call_operand.vmem [shape: f32[1,64], index: 5, kind: input, shape index: {}]   ;;  %s2636_s6 = inlined_call_operand.hbm [shape: f32[4,64,64], index: 6, kind: output, shape index: {}]  }
   0x1   :  { %12 = vsyncpa [#allocation7], 0  ;;  %s30_s23 = sshll.u32 %s2631_s1, 4  ;;  %s31_s23 = int_to_ptr.hbm [resolvable:$true] %s30_s23 }
   0x2   :  { %13 = vsyncpa [#allocation5], 0  ;;  %s1696_s24 = smov [#allocation6]   ;;  %s19_s28 = sshll.u32 %s2630_s0, 4  ;;  %s20_s28 = int_to_ptr.hbm [resolvable:$true] %s19_s28 }
   0x3   :  { %s32_s25 = sshll.u32 %s1696_s24, 4  ;;  %s1697_s29 = smov [#allocation3]   ;;  %s33_s25 = int_to_ptr.vmem [resolvable:$true] %s32_s25 }
   0x4   :  { %35 = dma.hbm_to_vmem [thread:$0]  %s31_s23, 64, %s33_s25, [#allocation7]  }
   0x5   :  { %s21_s30 = sshll.u32 %s1697_s29, 4  ;;  %s44_s9 = sshll.u32 %s2634_s4, 4  ;;  %s22_s30 = int_to_ptr.vmem [resolvable:$true] %s21_s30  ;;  %s45_s9 = int_to_ptr.hbm [resolvable:$true] %s44_s9 }
   0x6   :  { %24 = dma.hbm_to_vmem [thread:$0]  %s20_s28, 64, %s22_s30, [#allocation4]  }
   0x7   :  { %s1698_s1 = smov [#allocation8]   ;;  %s1699_s11 = smov 128  }
   0x8   :  { %s46_s10 = sshll.u32 %s1698_s1, 4  ;;  %s1700_s12 = smov 8   ;;  %s47_s10 = int_to_ptr.vmem [resolvable:$true] %s46_s10 }
   0x9   :  { %52 = dma.hbm_to_vmem [thread:$0]  %s45_s9, 1024, %s47_s10, [#allocation7], %s1699_s11, %s1699_s11, %s1700_s12  }
   0xa   :  { %1690 = dma.done.wait [#allocation4], 64  }
   0xb   :  { %1691 = vsyncadd [#allocation4], 4294967232 }
   0xc   :  { %1692 = dma.done.wait [#allocation7], 1088  }
   0xd   :  { %1693 = vsyncadd [#allocation7], 4294966208  ;;  %v1701_v0 = vmov 0   ;;  %vm80_vm0 = vcmask 523264   ;;  %v117_v1 = vld [vmem:[%s2633_s3 + $0x10] sm:$0xff]  ;;  %v107_v3 = vld [vmem:[%s2632_s2] sm:$0xff] }
   0xe   :  { %1431 = vset.pattern.permute.xlu1 %v1701_v0  ;;  %1430 = vset.pattern.permute.xlu0 %v1701_v0  ;;  %v106_v2 = vld [vmem:[#allocation3] sm:$0xf]  ;;  %v110_v4 = vld [vmem:[%s2632_s2 + $0x18] sm:$0xff]  ;;  %v113_v5 = vld [vmem:[%s2632_s2 + $0x30] sm:$0xff]  ;;  %v1702_v27 = vmov 2   ;;  %v1703_v28 = vmov 1  }
   0xf   :  { %1432 = vset.pattern.permute.xlu2 %v1701_v0  ;;  %135 = vperm.xlu1 %1431, %v117_v1   ;;  %v115_v6 = vld [vmem:[%s2633_s3] sm:$0xff]  ;;  %v118_v9 = vld [vmem:[%s2633_s3 + $0x18] sm:$0xff]  ;;  %v116_v11 = vld [vmem:[%s2633_s3 + $0x8] sm:$0xff]  ;;  %vm104_vm1 = vcmask 519168   ;;  %s1394_s21 = sshll.u32 %s2636_s6, 4  ;;  %s1395_s21 = int_to_ptr.hbm [resolvable:$true] %s1394_s21 }
  0x10   :  { %1409 = vmatpush.xpose.msk.msra.mxu1 %vm80_vm0, %v106_v2  ;;  %1418 = vmatpush.xpose.msk.msra.mxu2 %vm80_vm0, %v106_v2  ;;  %v75_v7 = vld [vmem:[#allocation8 + $0x38] sm:$0xff]  ;;  %v74_v8 = vld [vmem:[#allocation8 + $0x30] sm:$0xff]  ;;  %v73_v10 = vld [vmem:[#allocation8 + $0x28] sm:$0xff] }
  0x11   :  { %1419 = vmatpush.xpose.msk.msra.mxu3 %vm80_vm0, %v106_v2  ;;  %125 = vperm.xlu0 %1430, %v115_v6   ;;  %v119_v12 = vld [vmem:[%s2633_s3 + $0x20] sm:$0xff]  ;;  %v108_v13 = vld [vmem:[%s2632_s2 + $0x8] sm:$0xff]  ;;  %v114_v15 = vld [vmem:[%s2632_s2 + $0x38] sm:$0xff] }
  0x12   :  { %92 = vmatpush.msra.mxu0 %v75_v7  ;;  %v72_v14 = vld [vmem:[#allocation8 + $0x20] sm:$0xff]  ;;  %145 = vperm.xlu2 %1432, %v119_v12   ;;  %v111_v16 = vld [vmem:[%s2632_s2 + $0x20] sm:$0xff]  ;;  %v122_v19 = vld [vmem:[%s2633_s3 + $0x38] sm:$0xff] }
  0x13   :  { %1410 = vmatmul.msk.f32.vlgmr.msra.gmra.mxu1 %vm80_vm0, %v107_v3  ;;  %1413 = vmatmul.msk.f32.vlgmr.msra.gmra.mxu2 %vm80_vm0, %v110_v4  ;;  %v71_v17 = vld [vmem:[#allocation8 + $0x18] sm:$0xff]  ;;  %v70_v18 = vld [vmem:[#allocation8 + $0x10] sm:$0xff]  ;;  %v69_v20 = vld [vmem:[#allocation8 + $0x8] sm:$0xff] }
  0x14   :  { %1416 = vmatmul.msk.f32.vlgmr.msra.gmra.mxu3 %vm80_vm0, %v113_v5  ;;  %93 = vmatpush.msra.mxu0 %v74_v8  ;;  %v121_v21 = vld [vmem:[%s2633_s3 + $0x30] sm:$0xff]  ;;  %v67_v24 = vld [vmem:[#allocation6] sm:$0xf]  ;;  %v1464_v44 = vld [vmem:[%s2635_s5] ss:$0 sm:$0xff]  ;;  %s1705_s5 = smov [#allocation9]  }
  0x15   :  { %v109_v22 = vld [vmem:[%s2632_s2 + $0x10] sm:$0xff]  ;;  %v112_v25 = vld [vmem:[%s2632_s2 + $0x28] sm:$0xff]  ;;  %s1392_s18 = sshll.u32 %s1705_s5, 4  ;;  %s1393_s18 = int_to_ptr.vmem [resolvable:$true] %s1392_s18 }
  0x16   :  { %94 = vmatpush.msra.mxu0 %v73_v10  ;;  %v68_v23 = vld [vmem:[#allocation8] sm:$0xff] }
  0x17   :  { %140 = vperm.xlu1 %1431, %v118_v9   ;;  %v120_v26 = vld [vmem:[%s2633_s3 + $0x28] sm:$0xff] }
  0x18   :  { %95 = vmatpush.msra.mxu0 %v72_v14 }
  0x19   :  { %130 = vperm.xlu0 %1430, %v116_v11  }
  0x1a   :  { %96 = vmatpush.msra.mxu0 %v71_v17  ;;  %150 = vperm.xlu2 %1432, %v120_v26  }
  0x1b   :  { %1411 = vmatmul.msk.f32.gmra.mxu1 %vm80_vm0, %v108_v13  ;;  %1414 = vmatmul.msk.f32.gmra.mxu2 %vm80_vm0, %v111_v16 }
  0x1c   :  { %1417 = vmatmul.msk.f32.gmra.mxu3 %vm80_vm0, %v114_v15  ;;  %97 = vmatpush.msra.mxu0 %v70_v18 }
  0x1e   :  { %98 = vmatpush.msra.mxu0 %v69_v20 }
  0x1f   :  { %160 = vperm.xlu1 %1431, %v122_v19  }
  0x20   :  { %99 = vmatpush.msra.mxu0 %v68_v23 }
  0x21   :  { %155 = vperm.xlu0 %1430, %v121_v21   ;;  %1408 = vmatmul.msk.f32.vlgmr.msra.gmra.mxu0 %vm80_vm0, %v67_v24 }
  0x22   :  { %1436 = vset.pattern.permute.xlu2 %v1703_v28 }
  0x23   :  { %1412 = vmatmul.msk.f32.gmra.mxu1 %vm80_vm0, %v109_v22  ;;  %1415 = vmatmul.msk.f32.gmra.mxu2 %vm80_vm0, %v112_v25 }
  0x29   :  { %1434 = vset.pattern.permute.xlu0 %v1702_v27 }
  0x6c   :  { %v146_v50 = vpop.permute.xlu2 %145 }
  0x74   :  { %v151_v56 = vpop.permute.xlu2 %150 }
  0x81   :  { %v136_v29 = vpop.permute.xlu1 %135 }
  0x83   :  { %v126_v30 = vpop.permute.xlu0 %125 }
  0x89   :  { %v141_v33 = vpop.permute.xlu1 %140 }
  0x8b   :  { %v131_v38 = vpop.permute.xlu0 %130 }
  0x90   :  { %v207_v31 = vpop.f32.mrf.mxu1 }
  0x91   :  { %v1818_v32 = vadd.f32 %v207_v31, %v126_v30  ;;  %v161_v39 = vpop.permute.xlu1 %160 }
  0x93   :  { %823 = vperm.xlu0 %1434, %v1818_v32   ;;  %266 = vperm.xlu1 %1431, %v1818_v32   ;;  %v156_v43 = vpop.permute.xlu0 %155  ;;  %vm238_vm4 = vcmp.ge.f32.partialorder %v1818_v32, 0.0 }
  0x96   :  { %v216_v34 = vpop.f32.mrf.mxu2 }
  0x97   :  { %v225_v35 = vpop.f32.mrf.mxu3  ;;  %v1822_v36 = vadd.f32 %v216_v34, %v141_v33 }
  0x98   :  { %v210_v37 = vpop.f32.mrf.mxu1  ;;  %v1842_v49 = vadd.f32 %v225_v35, %v156_v43 }
  0x99   :  { %560 = vperm.xlu2 %1436, %v1822_v36   ;;  %v1839_v47 = vadd.f32 %v210_v37, %v131_v38  ;;  %vm241_vm2 = vcmp.ge.f32.partialorder %v1822_v36, 0.0 }
  0x9a   :  { %vm244_vm5 = vcmp.ge.f32.partialorder %v1842_v49, 0.0 }
  0x9b   :  { %1433 = vset.pattern.permute.xlu1 %v1703_v28  ;;  %vm239_vm7 = vcmp.ge.f32.partialorder %v1839_v47, 0.0 }
  0x9c   :  { %548 = vperm.xlu1 %1433, %v1818_v32  }
  0x9e   :  { %v101_v45 = vpop.f32.mrf.mxu0  ;;  %v219_v51 = vpop.f32.mrf.mxu2 }
  0x9f   :  { %v228_v40 = vpop.f32.mrf.mxu3  ;;  %v102_v48 = vadd.f32 %v1464_v44, %v101_v45  ;;  %v1861_v52 = vadd.f32 %v219_v51, %v146_v50 }
  0xa0   :  { %v1827_v41 = vadd.f32 %v228_v40, %v161_v39  ;;  %v213_v42 = vpop.f32.mrf.mxu1 }
  0xa1   :  { %1438 = vset.pattern.permute.xlu2 %v1702_v27  ;;  %v1837_v46 = vadd.f32 %v213_v42, %v136_v29  ;;  %105 = vst.msk [vmem:[#allocation2] sm:$0xf] %vm104_vm1, %v102_v48  ;;  %vm242_vm9 = vcmp.ge.f32.partialorder %v1861_v52, 0.0 }
  0xa2   :  { %851 = vperm.xlu0 %1434, %v1827_v41   ;;  %835 = vperm.xlu2 %1438, %v1822_v36   ;;  %vm245_vm8 = vcmp.ge.f32.partialorder %v1827_v41, 0.0 }
  0xa3   :  { %vm240_vm3 = vcmp.ge.f32.partialorder %v1837_v46, 0.0 }
  0xa4   :  { %1435 = vset.pattern.permute.xlu1 %v1701_v0 }
  0xa5   :  { %281 = vperm.xlu1 %1435, %v1822_v36  }
  0xa6   :  { %v222_v60 = vpop.f32.mrf.mxu2 }
  0xa7   :  { %v1883_v62 = vadd.f32 %v222_v60, %v151_v56 }
  0xa8   :  { %v231_v53 = vld [vmem:[#allocation2] sm:$0xf] }
  0xa9   :  { %v235_v54 = vsel %vm104_vm1, %v231_v53, inf  ;;  %v232_v55 = vsel %vm104_vm1, %v231_v53, -inf  ;;  %v1873_v57 = vperm.slane %v231_v53, 1  ;;  %v1880_v61 = vperm.slane %v231_v53, 2 }
  0xaa   :  { %1447 = vset.pattern.permute.xlu0 %v1703_v28  ;;  %1441 = vset.pattern.permute.xlu2 %v1703_v28  ;;  %v1889_v2 = vperm.slane %v231_v53, 0  ;;  %vm243_vm6 = vcmp.ge.f32.partialorder %v1883_v62, 0.0 }
  0xab   :  { %556 = vperm.xlu0 %1447, %v1837_v46   ;;  %552 = vperm.xlu2 %1441, %v1839_v47  }
  0xad   :  { %296 = vperm.xlu1 %1435, %v1842_v49  }
  0xb3   :  { %1449 = vset.pattern.permute.xlu0 %v1701_v0  ;;  %1442 = vset.pattern.permute.xlu2 %v1702_v27 }
  0xb4   :  { %827 = vperm.xlu2 %1442, %v1839_v47  }
  0xb5   :  { %1437 = vset.pattern.permute.xlu1 %v1703_v28 }
  0xb6   :  { %572 = vperm.xlu1 %1437, %v1842_v49  }
  0xbc   :  { %1444 = vset.pattern.permute.xlu2 %v1703_v28 }
  0xbd   :  { %576 = vperm.xlu2 %1444, %v1827_v41  }
  0xbe   :  { %1439 = vset.pattern.permute.xlu1 %v1702_v27 }
  0xbf   :  { %847 = vperm.xlu1 %1439, %v1842_v49  }
  0xc5   :  { %1450 = vset.pattern.permute.xlu2 %v1701_v0 }
  0xc7   :  { %1440 = vset.pattern.permute.xlu1 %v1701_v0 }
  0xc8   :  { %271 = vperm.xlu1 %1440, %v1839_v47  }
  0xd0   :  { %286 = vperm.xlu1 %1440, %v1861_v52  }
  0xd5   :  { %236 = vmin.xlane.f32.xlu0 %v235_v54 }
  0xd8   :  { %1443 = vset.pattern.permute.xlu1 %v1703_v28 }
  0xd9   :  { %564 = vperm.xlu1 %1443, %v1861_v52  }
  0xe1   :  { %1445 = vset.pattern.permute.xlu1 %v1702_v27 }
  0xe2   :  { %839 = vperm.xlu1 %1445, %v1861_v52  }
  0xe6   :  { %233 = vmax.xlane.f32.xlu2 %v232_v55 }
  0xe9   :  { %301 = vperm.xlu0 %1449, %v1827_v41  }
  0xea   :  { %1446 = vset.pattern.permute.xlu1 %v1701_v0 }
  0xeb   :  { %276 = vperm.xlu1 %1446, %v1837_v46  }
  0xf3   :  { %1448 = vset.pattern.permute.xlu1 %v1702_v27  ;;  %v561_v58 = vpop.permute.xlu2 %560 }
  0xf4   :  { %831 = vperm.xlu1 %1448, %v1837_v46   ;;  %v1878_v59 = vmul.f32 %v1873_v57, %v561_v58 }
  0xfc   :  { %1453 = vset.pattern.permute.xlu1 %v1701_v0  ;;  %v836_v63 = vpop.permute.xlu2 %835 }
  0xfd   :  { %v1886_v1 = vmul.f32 %v1880_v61, %v836_v63 }
  0xfe   :  { %291 = vperm.xlu2 %1450, %v1883_v62  }
 0x105   :  { %v824_v3 = vpop.permute.xlu0 %823  ;;  %v267_v4 = vpop.permute.xlu1 %266 }
 0x106   :  { %v553_v5 = vpop.permute.xlu2 %552  ;;  %v1892_v6 = vmul.f32 %v1880_v61, %v824_v3  ;;  %v1895_v7 = vmul.f32 %v1889_v2, %v267_v4  ;;  %1451 = vset.pattern.permute.xlu2 %v1703_v28 }
 0x107   :  { %v1898_v8 = vmul.f32 %v1873_v57, %v553_v5  ;;  %568 = vperm.xlu2 %1451, %v1883_v62  }
 0x10e   :  { %v549_v9 = vpop.permute.xlu1 %548  ;;  %v828_v10 = vpop.permute.xlu2 %827 }
 0x10f   :  { %v1903_v11 = vmul.f32 %v1873_v57, %v549_v9  ;;  %v1906_v12 = vmul.f32 %v1880_v61, %v828_v10  ;;  %1452 = vset.pattern.permute.xlu2 %v1702_v27 }
 0x110   :  { %843 = vperm.xlu2 %1452, %v1883_v62  }
 0x114   :  { %v852_v13 = vpop.permute.xlu0 %851 }
 0x115   :  { %v1911_v14 = vmul.f32 %v1880_v61, %v852_v13 }
 0x117   :  { %v282_v15 = vpop.permute.xlu1 %281  ;;  %v1935_v29 = vpop.permute.xlu2 %576 }
 0x118   :  { %v1914_v16 = vmul.f32 %v1889_v2, %v282_v15  ;;  %1454 = vset.pattern.permute.xlu2 %v1701_v0 }
 0x11d   :  { %v557_v17 = vpop.permute.xlu0 %556 }
 0x11e   :  { %v1918_v18 = vmul.f32 %v1873_v57, %v557_v17 }
 0x11f   :  { %v297_v19 = vpop.permute.xlu1 %296 }
 0x120   :  { %v1921_v20 = vmul.f32 %v1889_v2, %v297_v19 }
 0x128   :  { %v573_v21 = vpop.permute.xlu1 %572 }
 0x129   :  { %v1924_v22 = vmul.f32 %v1873_v57, %v573_v21 }
 0x131   :  { %v848_v23 = vpop.permute.xlu1 %847 }
 0x132   :  { %v1927_v24 = vmul.f32 %v1880_v61, %v848_v23 }
 0x13a   :  { %v1929_v25 = vpop.permute.xlu1 %271 }
 0x142   :  { %v1931_v26 = vpop.permute.xlu1 %286 }
 0x148   :  { %v1940_v33 = vpop.xlane.xlu0 %236 }
 0x149   :  { %v247_v34 = vperm.slane %v1940_v33, 0  ;;  %v1080_v53 = vperm.slane %v1940_v33, 3  ;;  %v1975_v60 = vperm.slane %v1940_v33, 1 }
 0x14b   :  { %v1933_v0 = vpop.permute.xlu1 %564 }
 0x154   :  { %v840_v30 = vpop.permute.xlu1 %839 }
 0x155   :  { %v1938_v31 = vmul.f32 %v1880_v61, %v840_v30 }
 0x159   :  { %v1943_v35 = vpop.xlane.xlu2 %233 }
 0x15a   :  { %v246_v37 = vperm.slane %v1943_v35, 0  ;;  %v1079_v54 = vperm.slane %v1943_v35, 3  ;;  %v529_v63 = vperm.slane %v1943_v35, 1 }
 0x15c   :  { %v251_v38 = vsel %vm241_vm2, %v246_v37, %v247_v34  ;;  %v250_v39 = vsel %vm240_vm3, %v246_v37, %v247_v34  ;;  %v248_v40 = vsel %vm238_vm4, %v246_v37, %v247_v34  ;;  %v254_v48 = vsel %vm244_vm5, %v246_v37, %v247_v34 }
 0x15d   :  { %v259_v42 = vmul.f32 %v251_v38, %v1822_v36  ;;  %v258_v43 = vmul.f32 %v250_v39, %v1837_v46  ;;  %v256_v44 = vmul.f32 %v248_v40, %v1818_v32  ;;  %v253_v50 = vsel %vm243_vm6, %v246_v37, %v247_v34 }
 0x15e   :  { %v249_v51 = vsel %vm239_vm7, %v246_v37, %v247_v34  ;;  %v262_v55 = vmul.f32 %v254_v48, %v1842_v49  ;;  %v261_v56 = vmul.f32 %v253_v50, %v1883_v62  ;;  %v1980_v3 = vsel %vm238_vm4, %v1079_v54, %v1080_v53 }
 0x15f   :  { %330 = vperm.xlu0 %1449, %v259_v42   ;;  %325 = vperm.xlu2 %1454, %v258_v43   ;;  %v257_v58 = vmul.f32 %v249_v51, %v1839_v47  ;;  %v1985_v5 = vsel %vm241_vm2, %v1079_v54, %v1080_v53  ;;  %v1993_v10 = vsel %vm240_vm3, %v1079_v54, %v1080_v53 }
 0x160   :  { %315 = vperm.xlu1 %1453, %v256_v44   ;;  %v1997_v13 = vsel %vm244_vm5, %v1079_v54, %v1080_v53  ;;  %v252_v15 = vsel %vm242_vm9, %v246_v37, %v247_v34  ;;  %v532_v17 = vsel %vm239_vm7, %v529_v63, %v1975_v60  ;;  %v2006_v19 = vsel %vm243_vm6, %v1079_v54, %v1080_v53 }
 0x161   :  { %v1958_v45 = vpop.permute.xlu2 %291  ;;  %v2010_v21 = vsel %vm239_vm7, %v1079_v54, %v1080_v53  ;;  %v533_v23 = vsel %vm240_vm3, %v529_v63, %v1975_v60  ;;  %v2017_v30 = vsel %vm242_vm9, %v1079_v54, %v1080_v53  ;;  %v2021_v38 = vsel %vm245_vm8, %v1079_v54, %v1080_v53 }
 0x162   :  { %v260_v39 = vmul.f32 %v252_v15, %v1861_v52  ;;  %v540_v40 = vmul.f32 %v532_v17, %v1839_v47  ;;  %v541_v42 = vmul.f32 %v533_v23, %v1837_v46  ;;  %v255_v48 = vsel %vm245_vm8, %v246_v37, %v247_v34 }
 0x163   :  { %v535_v50 = vsel %vm242_vm9, %v529_v63, %v1975_v60  ;;  %v536_v51 = vsel %vm243_vm6, %v529_v63, %v1975_v60  ;;  %v263_v53 = vmul.f32 %v255_v48, %v1827_v41  ;;  %v804_v34 = vperm.slane %v1943_v35, 2 }
 0x164   :  { %v543_v54 = vmul.f32 %v535_v50, %v1861_v52  ;;  %v538_v37 = vsel %vm245_vm8, %v529_v63, %v1975_v60  ;;  %v534_v35 = vsel %vm241_vm2, %v529_v63, %v1975_v60 }
 0x165   :  { %v546_v15 = vmul.f32 %v538_v37, %v1827_v41 }
 0x167   :  { %345 = vperm.xlu0 %1449, %v262_v55   ;;  %340 = vperm.xlu2 %1454, %v261_v56   ;;  %v544_v55 = vmul.f32 %v536_v51, %v1883_v62  ;;  %v805_v56 = vperm.slane %v1940_v33, 2 }
 0x168   :  { %320 = vperm.xlu1 %1453, %v257_v58   ;;  %v531_v58 = vsel %vm238_vm4, %v529_v63, %v1975_v60 }
 0x169   :  { %v569_v4 = vpop.permute.xlu2 %568  ;;  %v539_v17 = vmul.f32 %v531_v58, %v1818_v32  ;;  %v808_v23 = vsel %vm240_vm3, %v804_v34, %v805_v56  ;;  %v811_v48 = vsel %vm243_vm6, %v804_v34, %v805_v56  ;;  %v812_v50 = vsel %vm244_vm5, %v804_v34, %v805_v56 }
 0x16a   :  { %v1988_v9 = vmul.f32 %v1873_v57, %v569_v4  ;;  %v806_v4 = vsel %vm238_vm4, %v804_v34, %v805_v56  ;;  %v813_v58 = vsel %vm245_vm8, %v804_v34, %v805_v56 }
 0x16b   :  { %v814_v33 = vmul.f32 %v806_v4, %v1818_v32  ;;  %v821_v4 = vmul.f32 %v813_v58, %v1827_v41 }
 0x16f   :  { %1456 = vset.pattern.permute.xlu0 %v1703_v28  ;;  %1457 = vset.pattern.permute.xlu2 %v1703_v28 }
 0x170   :  { %335 = vperm.xlu1 %1453, %v260_v39   ;;  %595 = vperm.xlu0 %1456, %v540_v40   ;;  %v809_v39 = vsel %vm241_vm2, %v804_v34, %v805_v56  ;;  %v542_v40 = vmul.f32 %v534_v35, %v1822_v36 }
 0x171   :  { %600 = vperm.xlu2 %1457, %v541_v42   ;;  %v844_v43 = vpop.permute.xlu2 %843  ;;  %v817_v42 = vmul.f32 %v809_v39, %v1822_v36  ;;  %v310_v39 = vmul.f32 %v1889_v2, %v1958_v45 }
 0x172   :  { %v2029_v44 = vmul.f32 %v1880_v61, %v844_v43  ;;  %v537_v43 = vsel %vm244_vm5, %v529_v63, %v1975_v60  ;;  %v810_v63 = vsel %vm242_vm9, %v804_v34, %v805_v56 }
 0x173   :  { %v545_v51 = vmul.f32 %v537_v43, %v1842_v49  ;;  %v818_v37 = vmul.f32 %v810_v63, %v1861_v52 }
 0x178   :  { %350 = vperm.xlu1 %1453, %v263_v53   ;;  %610 = vperm.xlu0 %1456, %v543_v54   ;;  %v819_v53 = vmul.f32 %v811_v48, %v1883_v62  ;;  %v820_v54 = vmul.f32 %v812_v50, %v1842_v49 }
 0x179   :  { %615 = vperm.xlu2 %1457, %v544_v55   ;;  %v807_v55 = vsel %vm239_vm7, %v804_v34, %v805_v56 }
 0x17a   :  { %v815_v60 = vmul.f32 %v807_v55, %v1839_v47  ;;  %v306_v55 = vmul.f32 %v1889_v2, %v1929_v25  ;;  %v309_v25 = vmul.f32 %v1889_v2, %v1931_v26 }
 0x180   :  { %1455 = vset.pattern.permute.xlu1 %v1703_v28  ;;  %625 = vperm.xlu0 %1456, %v546_v15   ;;  %v816_v28 = vmul.f32 %v808_v23, %v1837_v46  ;;  %v277_v15 = vpop.permute.xlu1 %276 }
 0x181   :  { %1458 = vset.pattern.permute.xlu2 %v1702_v27  ;;  %590 = vperm.xlu1 %1455, %v539_v17  }
 0x182   :  { %865 = vperm.xlu2 %1458, %v814_v33   ;;  %v307_v33 = vmul.f32 %v1889_v2, %v277_v15 }
 0x188   :  { %1460 = vset.pattern.permute.xlu0 %v1702_v27 }
 0x189   :  { %605 = vperm.xlu1 %1455, %v542_v40   ;;  %875 = vperm.xlu0 %1460, %v816_v28   ;;  %v302_v40 = vpop.permute.xlu0 %301  ;;  %v2091_v28 = vpop.permute.xlu1 %831 }
 0x18a   :  { %880 = vperm.xlu2 %1458, %v817_v42  }
 0x191   :  { %620 = vperm.xlu1 %1455, %v545_v51   ;;  %890 = vperm.xlu0 %1460, %v819_v53  }
 0x192   :  { %895 = vperm.xlu2 %1458, %v820_v54  }
 0x199   :  { %1459 = vset.pattern.permute.xlu1 %v1702_v27 }
 0x19a   :  { %870 = vperm.xlu1 %1459, %v815_v60  }
 0x1a2   :  { %885 = vperm.xlu1 %1459, %v818_v37  }
 0x1aa   :  { %900 = vperm.xlu1 %1459, %v821_v4  }
 0x1b9   :  { %v326_v17 = vpop.permute.xlu2 %325 }
 0x1ba   :  { %v355_v35 = vsub.f32 %v307_v33, %v326_v17 }
 0x1bc   :  { %v365_v23 = vmul.f32 1.442695, %v355_v35 }
 0x1be   :  { %1465 = vpow2.f32 %v365_v23 }
 0x1c1   :  { %v341_v27 = vpop.permute.xlu2 %340 }
 0x1c2   :  { %v358_v42 = vsub.f32 %v310_v39, %v341_v27 }
 0x1c4   :  { %v371_v43 = vmul.f32 1.442695, %v358_v42  ;;  %v2093_v56 = vpop.eup %1465 }
 0x1c5   :  { %v383_v51 = vsel %vm80_vm0, %v2093_v56, 0.0 }
 0x1c6   :  { %1467 = vpow2.f32 %v371_v43 }
 0x1cb   :  { %v601_v33 = vpop.permute.xlu2 %600 }
 0x1cc   :  { %v2099_v54 = vpop.eup %1467 }
 0x1d1   :  { %v331_v34 = vpop.permute.xlu0 %330 }
 0x1d2   :  { %v316_v48 = vpop.permute.xlu1 %315  ;;  %v356_v53 = vsub.f32 %v1914_v16, %v331_v34 }
 0x1d3   :  { %v353_v50 = vsub.f32 %v1895_v7, %v316_v48  ;;  %v392_v7 = vsel %vm80_vm0, %v2099_v54, 0.0 }
 0x1d4   :  { %384 = vadd.xlane.f32.xlu1 %v383_v51  ;;  %v367_v60 = vmul.f32 1.442695, %v356_v53  ;;  %v584_v51 = vmul.f32 %v1873_v57, %v1933_v0 }
 0x1d5   :  { %v361_v45 = vmul.f32 1.442695, %v353_v50 }
 0x1d7   :  { %1469 = vpow2.f32 %v361_v45 }
 0x1d8   :  { %1471 = vpow2.f32 %v367_v60 }
 0x1d9   :  { %v346_v63 = vpop.permute.xlu0 %345 }
 0x1da   :  { %v321_v37 = vpop.permute.xlu1 %320  ;;  %v359_v16 = vsub.f32 %v1921_v20, %v346_v63 }
 0x1db   :  { %v354_v58 = vsub.f32 %v306_v55, %v321_v37  ;;  %v616_v37 = vpop.permute.xlu2 %615 }
 0x1dc   :  { %393 = vadd.xlane.f32.xlu1 %v392_v7  ;;  %v373_v35 = vmul.f32 1.442695, %v359_v16  ;;  %v630_v7 = vsub.f32 %v1918_v18, %v601_v33  ;;  %v587_v18 = vmul.f32 %v1873_v57, %v1935_v29  ;;  %v857_v29 = vmul.f32 %v1880_v61, %v2091_v28 }
 0x1dd   :  { %v2105_v4 = vpop.eup %1469  ;;  %v363_v15 = vmul.f32 1.442695, %v354_v58 }
 0x1de   :  { %v377_v17 = vsel %vm80_vm0, %v2105_v4, 0.0  ;;  %v2112_v39 = vpop.eup %1471 }
 0x1df   :  { %1473 = vpow2.f32 %v363_v15  ;;  %378 = vadd.xlane.f32.xlu2 %v377_v17  ;;  %v386_v50 = vsel %vm80_vm0, %v2112_v39, 0.0 }
 0x1e0   :  { %1475 = vpow2.f32 %v373_v35 }
 0x1e2   :  { %v336_v23 = vpop.permute.xlu1 %335  ;;  %v596_v27 = vpop.permute.xlu0 %595 }
 0x1e3   :  { %v357_v42 = vsub.f32 %v309_v25, %v336_v23  ;;  %v629_v43 = vsub.f32 %v1898_v8, %v596_v27  ;;  %v312_v8 = vmul.f32 %v1889_v2, %v302_v40  ;;  %v640_v25 = vmul.f32 1.442695, %v630_v7 }
 0x1e5   :  { %v2115_v34 = vpop.eup %1473  ;;  %v369_v20 = vmul.f32 1.442695, %v357_v42  ;;  %v638_v48 = vmul.f32 1.442695, %v629_v43  ;;  %v633_v43 = vsub.f32 %v1988_v9, %v616_v37 }
 0x1e6   :  { %v380_v26 = vsel %vm80_vm0, %v2115_v34, 0.0  ;;  %v2124_v55 = vpop.eup %1475 }
 0x1e7   :  { %1477 = vpow2.f32 %v369_v20  ;;  %387 = vadd.xlane.f32.xlu2 %v386_v50  ;;  %381 = vadd.xlane.f32.xlu0 %v380_v26  ;;  %v395_v0 = vsel %vm80_vm0, %v2124_v55, 0.0  ;;  %v866_v50 = vpop.permute.xlu2 %865 }
 0x1e8   :  { %1479 = vpow2.f32 %v638_v48  ;;  %v903_v37 = vsub.f32 %v1892_v6, %v866_v50  ;;  %v1704_v6 = vmov 3  }
 0x1e9   :  { %1461 = vset.pattern.permute.xlu1 %v1704_v6  ;;  %1462 = vset.pattern.permute.xlu0 %v1704_v6 }
 0x1ea   :  { %v351_v53 = vpop.permute.xlu1 %350  ;;  %v611_v45 = vpop.permute.xlu0 %610  ;;  %1463 = vset.pattern.permute.xlu2 %v1704_v6 }
 0x1eb   :  { %v360_v60 = vsub.f32 %v312_v8, %v351_v53  ;;  %v632_v63 = vsub.f32 %v584_v51, %v611_v45 }
 0x1ed   :  { %v2126_v58 = vpop.eup %1477  ;;  %v375_v16 = vmul.f32 1.442695, %v360_v60  ;;  %v644_v15 = vmul.f32 1.442695, %v632_v63 }
 0x1ee   :  { %v2129_v17 = vpop.eup %1479  ;;  %v389_v2 = vsel %vm80_vm0, %v2126_v58, 0.0 }
 0x1ef   :  { %1481 = vpow2.f32 %v375_v16  ;;  %396 = vadd.xlane.f32.xlu2 %v395_v0  ;;  %390 = vadd.xlane.f32.xlu0 %v389_v2  ;;  %v655_v40 = vsel %vm80_vm0, %v2129_v17, 0.0  ;;  %v881_v28 = vpop.permute.xlu2 %880  ;;  %v911_v2 = vmul.f32 1.442695, %v903_v37 }
 0x1f0   :  { %1483 = vpow2.f32 %v644_v15  ;;  %656 = vadd.xlane.f32.xlu1 %v655_v40 }
 0x1f1   :  { %1485 = vpow2.f32 %v640_v25 }
 0x1f2   :  { %v626_v33 = vpop.permute.xlu0 %625 }
 0x1f3   :  { %v635_v35 = vsub.f32 %v587_v18, %v626_v33  ;;  %v591_v23 = vpop.permute.xlu1 %590 }
 0x1f4   :  { %v628_v27 = vsub.f32 %v1903_v11, %v591_v23  ;;  %v646_v11 = vmul.f32 1.442695, %v633_v43  ;;  %v906_v23 = vsub.f32 %v1886_v1, %v881_v28 }
 0x1f5   :  { %v2140_v42 = vpop.eup %1481  ;;  %v650_v20 = vmul.f32 1.442695, %v635_v35 }
 0x1f6   :  { %v2143_v48 = vpop.eup %1483  ;;  %v636_v26 = vmul.f32 1.442695, %v628_v27  ;;  %v398_v51 = vsel %vm80_vm0, %v2140_v42, 0.0 }
 0x1f7   :  { %1487 = vpow2.f32 %v650_v20  ;;  %399 = vadd.xlane.f32.xlu0 %v398_v51  ;;  %v664_v57 = vsel %vm80_vm0, %v2143_v48, 0.0  ;;  %v2151_v9 = vpop.eup %1485  ;;  %v896_v1 = vpop.permute.xlu2 %895 }
 0x1f8   :  { %1489 = vpow2.f32 %v636_v26  ;;  %665 = vadd.xlane.f32.xlu1 %v664_v57  ;;  %v658_v0 = vsel %vm80_vm0, %v2151_v9, 0.0 }
 0x1f9   :  { %1491 = vpow2.f32 %v646_v11 }
 0x1fb   :  { %v606_v8 = vpop.permute.xlu1 %605  ;;  %v876_v53 = vpop.permute.xlu0 %875 }
 0x1fc   :  { %v631_v45 = vsub.f32 %v1878_v59, %v606_v8  ;;  %v905_v60 = vsub.f32 %v857_v29, %v876_v53  ;;  %v909_v29 = vsub.f32 %v1927_v24, %v896_v1 }
 0x1fd   :  { %v2154_v63 = vpop.eup %1487 }
 0x1fe   :  { %v2157_v7 = vpop.eup %1489  ;;  %v642_v16 = vmul.f32 1.442695, %v631_v45  ;;  %v915_v15 = vmul.f32 1.442695, %v905_v60  ;;  %v673_v61 = vsel %vm80_vm0, %v2154_v63, 0.0 }
 0x1ff   :  { %659 = vadd.xlane.f32.xlu0 %v658_v0  ;;  %v652_v59 = vsel %vm80_vm0, %v2157_v7, 0.0  ;;  %v2165_v40 = vpop.eup %1491  ;;  %v923_v0 = vmul.f32 1.442695, %v909_v29 }
 0x200   :  { %1493 = vpow2.f32 %v642_v16  ;;  %653 = vadd.xlane.f32.xlu2 %v652_v59  ;;  %674 = vadd.xlane.f32.xlu1 %v673_v61  ;;  %v667_v50 = vsel %vm80_vm0, %v2165_v40, 0.0 }
 0x201   :  { %1495 = vpow2.f32 %v915_v15 }
 0x202   :  { %1497 = vpow2.f32 %v911_v2 }
 0x203   :  { %v621_v18 = vpop.permute.xlu1 %620  ;;  %v891_v25 = vpop.permute.xlu0 %890 }
 0x204   :  { %v634_v33 = vsub.f32 %v1924_v22, %v621_v18  ;;  %v908_v35 = vsub.f32 %v2029_v44, %v891_v25  ;;  %v917_v44 = vmul.f32 1.442695, %v906_v23 }
 0x206   :  { %v2170_v27 = vpop.eup %1493  ;;  %v648_v43 = vmul.f32 1.442695, %v634_v33  ;;  %v921_v20 = vmul.f32 1.442695, %v908_v35 }
 0x207   :  { %v2174_v26 = vpop.eup %1495  ;;  %668 = vadd.xlane.f32.xlu0 %v667_v50  ;;  %v661_v51 = vsel %vm80_vm0, %v2170_v27, 0.0 }
 0x208   :  { %1499 = vpow2.f32 %v648_v43  ;;  %662 = vadd.xlane.f32.xlu2 %v661_v51  ;;  %v933_v22 = vsel %vm80_vm0, %v2174_v26, 0.0  ;;  %v2180_v57 = vpop.eup %1497  ;;  %v1092_v51 = vmul.f32 %v1985_v5, %v1822_v36 }
 0x209   :  { %1501 = vpow2.f32 %v921_v20  ;;  %934 = vadd.xlane.f32.xlu1 %v933_v22  ;;  %v927_v45 = vsel %vm80_vm0, %v2180_v57, 0.0 }
 0x20a   :  { %1503 = vpow2.f32 %v917_v44  ;;  %v1091_v44 = vmul.f32 %v1993_v10, %v1837_v46 }
 0x20c   :  { %v871_v11 = vpop.permute.xlu1 %870 }
 0x20d   :  { %v904_v8 = vsub.f32 %v1906_v12, %v871_v11 }
 0x20e   :  { %v2184_v53 = vpop.eup %1499 }
 0x20f   :  { %v2188_v60 = vpop.eup %1501  ;;  %v913_v37 = vmul.f32 1.442695, %v904_v8  ;;  %928 = vadd.xlane.f32.xlu0 %v927_v45  ;;  %v670_v16 = vsel %vm80_vm0, %v2184_v53, 0.0 }
 0x210   :  { %671 = vadd.xlane.f32.xlu2 %v670_v16  ;;  %v942_v15 = vsel %vm80_vm0, %v2188_v60, 0.0  ;;  %v2194_v12 = vpop.eup %1503 }
 0x211   :  { %1505 = vpow2.f32 %v913_v37  ;;  %943 = vadd.xlane.f32.xlu1 %v942_v15  ;;  %v936_v59 = vsel %vm80_vm0, %v2194_v12, 0.0 }
 0x212   :  { %1507 = vpow2.f32 %v923_v0 }
 0x214   :  { %v886_v24 = vpop.permute.xlu1 %885 }
 0x215   :  { %v907_v61 = vsub.f32 %v1938_v31, %v886_v24 }
 0x217   :  { %v2199_v28 = vpop.eup %1505  ;;  %v919_v2 = vmul.f32 1.442695, %v907_v61  ;;  %937 = vadd.xlane.f32.xlu0 %v936_v59 }
 0x218   :  { %v930_v6 = vsel %vm80_vm0, %v2199_v28, 0.0  ;;  %v2203_v18 = vpop.eup %1507 }
 0x219   :  { %1509 = vpow2.f32 %v919_v2  ;;  %931 = vadd.xlane.f32.xlu2 %v930_v6  ;;  %v945_v31 = vsel %vm80_vm0, %v2203_v18, 0.0 }
 0x21c   :  { %v901_v25 = vpop.permute.xlu1 %900 }
 0x21d   :  { %v910_v33 = vsub.f32 %v1911_v14, %v901_v25  ;;  %v1089_v14 = vmul.f32 %v1980_v3, %v1818_v32 }
 0x21f   :  { %v2208_v35 = vpop.eup %1509  ;;  %v925_v23 = vmul.f32 1.442695, %v910_v33  ;;  %946 = vadd.xlane.f32.xlu0 %v945_v31 }
 0x220   :  { %v939_v43 = vsel %vm80_vm0, %v2208_v35, 0.0 }
 0x221   :  { %1511 = vpow2.f32 %v925_v23  ;;  %940 = vadd.xlane.f32.xlu2 %v939_v43 }
 0x227   :  { %v2212_v20 = vpop.eup %1511 }
 0x228   :  { %v948_v50 = vsel %vm80_vm0, %v2212_v20, 0.0 }
 0x229   :  { %949 = vadd.xlane.f32.xlu2 %v948_v50 }
 0x22a   :  { %1098 = vperm.xlu1 %1461, %v1818_v32   ;;  %v1095_v32 = vmul.f32 %v1997_v13, %v1842_v49 }
 0x232   :  { %1110 = vperm.xlu1 %1461, %v1822_v36   ;;  %v1094_v36 = vmul.f32 %v2006_v19, %v1883_v62 }
 0x233   :  { %1102 = vperm.xlu0 %1462, %v1839_v47  }
 0x23a   :  { %1118 = vperm.xlu1 %1461, %v1883_v62   ;;  %v1090_v62 = vmul.f32 %v2010_v21, %v1839_v47 }
 0x23b   :  { %1140 = vperm.xlu0 %1462, %v1089_v14   ;;  %v1093_v14 = vmul.f32 %v2017_v30, %v1861_v52 }
 0x241   :  { %1106 = vperm.xlu2 %1463, %v1837_v46  }
 0x242   :  { %1126 = vperm.xlu1 %1461, %v1827_v41  }
 0x243   :  { %1155 = vperm.xlu0 %1462, %v1092_v51  }
 0x247   :  { %v385_v22 = vpop.xlane.xlu1 %384 }
 0x248   :  { %1513 = vrcp.f32 %v385_v22  ;;  %v442_v29 = vand.u32 2147483648, %v385_v22  ;;  %v440_v8 = vand.u32 2147483647, %v385_v22  ;;  %vm436_vm11 = vweird.f32 %v385_v22 }
 0x249   :  { %1114 = vperm.xlu2 %1463, %v1861_v52  }
 0x24a   :  { %1150 = vperm.xlu1 %1461, %v1091_v44   ;;  %v443_v37 = vor.u32 1.1754944e-38, %v442_v29  ;;  %vm441_vm13 = vcmp.eq.f32.partialorder %v440_v8, 8.507059e+37 }
 0x24b   :  { %1170 = vperm.xlu0 %1462, %v1095_v32  }
 0x24e   :  { %v1514_v3 = vpop.eup %1513 }
 0x24f   :  { %v432_v1 = vmul.f32 %v1514_v3, %v385_v22  ;;  %v394_v11 = vpop.xlane.xlu1 %393  ;;  %vm437_vm10 = vweird.f32 %v1514_v3 }
 0x250   :  { %1515 = vrcp.f32 %v394_v11  ;;  %vm438_vm12 = vmor %vm436_vm11, %vm437_vm10  ;;  %v487_v61 = vand.u32 2147483648, %v394_v11  ;;  %v485_v33 = vand.u32 2147483647, %v394_v11  ;;  %vm481_vm15 = vweird.f32 %v394_v11 }
 0x251   :  { %v433_v5 = vsub.f32 1.0, %v432_v1  ;;  %1122 = vperm.xlu2 %1463, %v1842_v49  }
 0x252   :  { %1165 = vperm.xlu1 %1461, %v1094_v36   ;;  %v379_v46 = vpop.xlane.xlu2 %378  ;;  %vm486_vm3 = vcmp.eq.f32.partialorder %v485_v33, 8.507059e+37 }
 0x253   :  { %v434_v10 = vmul.f32 %v1514_v3, %v433_v5  ;;  %1517 = vrcp.f32 %v379_v46  ;;  %v412_v21 = vand.u32 2147483648, %v379_v46  ;;  %v410_v43 = vand.u32 2147483647, %v379_v46 }
 0x254   :  { %vm406_vm4 = vweird.f32 %v379_v46 }
 0x255   :  { %v435_v13 = vadd.f32 %v1514_v3, %v434_v10  ;;  %vm411_vm6 = vcmp.eq.f32.partialorder %v410_v43, 8.507059e+37 }
 0x256   :  { %v1516_v45 = vpop.eup %1515 }
 0x257   :  { %v439_v16 = vsel %vm438_vm12, %v1514_v3, %v435_v13  ;;  %v477_v15 = vmul.f32 %v1516_v45, %v394_v11  ;;  %vm482_vm14 = vweird.f32 %v1516_v45  ;;  %v413_v3 = vor.u32 1.1754944e-38, %v412_v21 }
 0x258   :  { %v444_v19 = vsel %vm441_vm13, %v443_v37, %v439_v16  ;;  %vm483_vm1 = vmor %vm481_vm15, %vm482_vm14 }
 0x259   :  { %v1518_v49 = vpop.eup %1517  ;;  %v523_v0 = vmul.f32 %v2093_v56, %v444_v19  ;;  %v478_v24 = vsub.f32 1.0, %v477_v15  ;;  %1145 = vperm.xlu2 %1463, %v1090_v62   ;;  %v488_v56 = vor.u32 1.1754944e-38, %v487_v61  ;;  %v1096_v62 = vmul.f32 %v2021_v38, %v1827_v41 }
 0x25a   :  { %v402_v59 = vmul.f32 %v1518_v49, %v379_v46  ;;  %v382_v2 = vpop.xlane.xlu0 %381  ;;  %v2237_v6 = vpop.xlane.xlu2 %387  ;;  %vm407_vm2 = vweird.f32 %v1518_v49 }
 0x25b   :  { %1358 = vst.msk [vmem:[#allocation9 + $0x10] sm:$0xff] %vm80_vm0, %v523_v0  ;;  %v479_v25 = vmul.f32 %v1516_v45, %v478_v24  ;;  %1519 = vrcp.f32 %v382_v2  ;;  %vm408_vm5 = vmor %vm406_vm4, %vm407_vm2  ;;  %v425_v8 = vand.u32 2147483647, %v382_v2  ;;  %v427_v13 = vand.u32 2147483648, %v382_v2 }
 0x25c   :  { %v403_v31 = vsub.f32 1.0, %v402_v59  ;;  %1521 = vrcp.f32 %v2237_v6  ;;  %v455_v37 = vand.u32 2147483647, %v2237_v6  ;;  %v457_v16 = vand.u32 2147483648, %v2237_v6 }
 0x25d   :  { %v480_v47 = vadd.f32 %v1516_v45, %v479_v25  ;;  %vm421_vm8 = vweird.f32 %v382_v2  ;;  %vm2261_vm10 = vcmp.eq.f32.partialorder %v425_v8, 8.507059e+37  ;;  %v428_v0 = vor.u32 1.1754944e-38, %v427_v13 }
 0x25e   :  { %v404_v23 = vmul.f32 %v1518_v49, %v403_v31  ;;  %vm451_vm11 = vweird.f32 %v2237_v6  ;;  %vm2266_vm13 = vcmp.eq.f32.partialorder %v455_v37, 8.507059e+37  ;;  %v458_v41 = vor.u32 1.1754944e-38, %v457_v16 }
 0x25f   :  { %v484_v50 = vsel %vm483_vm1, %v1516_v45, %v480_v47 }
 0x260   :  { %v489_v51 = vsel %vm486_vm3, %v488_v56, %v484_v50  ;;  %v405_v22 = vadd.f32 %v1518_v49, %v404_v23 }
 0x261   :  { %v1520_v44 = vpop.eup %1519  ;;  %v526_v32 = vmul.f32 %v2099_v54, %v489_v51  ;;  %1160 = vperm.xlu2 %1463, %v1093_v14  }
 0x262   :  { %v1522_v1 = vpop.eup %1521  ;;  %v409_v11 = vsel %vm408_vm5, %v1518_v49, %v405_v22  ;;  %v417_v36 = vmul.f32 %v1520_v44, %v382_v2  ;;  %v2244_v5 = vpop.xlane.xlu0 %390  ;;  %vm422_vm7 = vweird.f32 %v1520_v44 }
 0x263   :  { %v2246_v29 = vpop.xlane.xlu2 %396  ;;  %1361 = vst.msk [vmem:[#allocation9 + $0x28] sm:$0xff] %vm80_vm0, %v526_v32  ;;  %v414_v52 = vsel %vm411_vm6, %v413_v3, %v409_v11  ;;  %v447_v30 = vmul.f32 %v1522_v1, %v2237_v6  ;;  %1523 = vrcp.f32 %v2244_v5  ;;  %v2251_v46 = vpop.xlane.xlu1 %656  ;;  %vm452_vm9 = vweird.f32 %v1522_v1  ;;  %vm423_vm12 = vmor %vm421_vm8, %vm422_vm7 }
 0x264   :  { %v521_v54 = vmul.f32 %v2105_v4, %v414_v52  ;;  %v418_v10 = vsub.f32 1.0, %v417_v36  ;;  %1525 = vrcp.f32 %v2246_v29  ;;  %v470_v38 = vand.u32 2147483647, %v2244_v5  ;;  %vm453_vm14 = vmor %vm451_vm11, %vm452_vm9 }
 0x265   :  { %v448_v45 = vsub.f32 1.0, %v447_v30  ;;  %1527 = vrcp.f32 %v2251_v46  ;;  %vm466_vm15 = vweird.f32 %v2244_v5  ;;  %v472_v33 = vand.u32 2147483648, %v2244_v5 }
 0x266   :  { %1356 = vst.msk [vmem:[#allocation9] sm:$0xff] %vm80_vm0, %v521_v54  ;;  %v419_v15 = vmul.f32 %v1520_v44, %v418_v10  ;;  %vm496_vm1 = vweird.f32 %v2246_v29  ;;  %vm2287_vm2 = vcmp.eq.f32.partialorder %v470_v38, 8.507059e+37  ;;  %v500_v32 = vand.u32 2147483647, %v2246_v29 }
 0x267   :  { %v449_v19 = vmul.f32 %v1522_v1, %v448_v45  ;;  %v502_v3 = vand.u32 2147483648, %v2246_v29  ;;  %v473_v36 = vor.u32 1.1754944e-38, %v472_v33  ;;  %v702_v52 = vand.u32 2147483648, %v2251_v46 }
 0x268   :  { %v420_v4 = vadd.f32 %v1520_v44, %v419_v15  ;;  %vm2301_vm6 = vcmp.eq.f32.partialorder %v500_v32, 8.507059e+37  ;;  %vm696_vm7 = vweird.f32 %v2251_v46 }
 0x269   :  { %v1524_v24 = vpop.eup %1523  ;;  %v450_v61 = vadd.f32 %v1522_v1, %v449_v19  ;;  %1175 = vperm.xlu2 %1463, %v1096_v62   ;;  %v503_v45 = vor.u32 1.1754944e-38, %v502_v3  ;;  %v703_v49 = vor.u32 1.1754944e-38, %v702_v52 }
 0x26a   :  { %v424_v2 = vsel %vm423_vm12, %v1520_v44, %v420_v4  ;;  %v462_v25 = vmul.f32 %v1524_v24, %v2244_v5  ;;  %v2274_v6 = vpop.xlane.xlu0 %399  ;;  %v1526_v31 = vpop.eup %1525  ;;  %vm467_vm3 = vweird.f32 %v1524_v24 }
 0x26b   :  { %v429_v47 = vsel %vm2261_vm10, %v428_v0, %v424_v2  ;;  %v454_v21 = vsel %vm453_vm14, %v1522_v1, %v450_v61  ;;  %1529 = vrcp.f32 %v2274_v6  ;;  %v2280_v56 = vpop.xlane.xlu1 %665  ;;  %v492_v14 = vmul.f32 %v1526_v31, %v2246_v29  ;;  %v1528_v51 = vpop.eup %1527  ;;  %vm468_vm5 = vmor %vm466_vm15, %vm467_vm3 }
 0x26c   :  { %v522_v23 = vmul.f32 %v2115_v34, %v429_v47  ;;  %v459_v43 = vsel %vm2266_vm13, %v458_v41, %v454_v21  ;;  %v463_v50 = vsub.f32 1.0, %v462_v25  ;;  %v692_v11 = vmul.f32 %v1528_v51, %v2251_v46 }
 0x26d   :  { %v524_v22 = vmul.f32 %v2112_v39, %v459_v43  ;;  %v493_v1 = vsub.f32 1.0, %v492_v14  ;;  %v700_v39 = vand.u32 2147483647, %v2251_v46  ;;  %1531 = vrcp.f32 %v2280_v56 }
 0x26e   :  { %1357 = vst.msk [vmem:[#allocation9 + $0x8] sm:$0xff] %vm80_vm0, %v522_v23  ;;  %v464_v34 = vmul.f32 %v1524_v24, %v463_v50  ;;  %vm497_vm4 = vweird.f32 %v1526_v31  ;;  %v693_v10 = vsub.f32 1.0, %v692_v11  ;;  %vm697_vm8 = vweird.f32 %v1528_v51 }
 0x26f   :  { %1359 = vst.msk [vmem:[#allocation9 + $0x18] sm:$0xff] %vm80_vm0, %v524_v22  ;;  %v494_v54 = vmul.f32 %v1526_v31, %v493_v1  ;;  %vm498_vm9 = vmor %vm496_vm1, %vm497_vm4  ;;  %vm2313_vm10 = vcmp.eq.f32.partialorder %v700_v39, 8.507059e+37  ;;  %v515_v0 = vand.u32 2147483647, %v2274_v6  ;;  %v517_v29 = vand.u32 2147483648, %v2274_v6 }
 0x270   :  { %v465_v30 = vadd.f32 %v1524_v24, %v464_v34  ;;  %v694_v15 = vmul.f32 %v1528_v51, %v693_v10  ;;  %vm698_vm11 = vmor %vm696_vm7, %vm697_vm8  ;;  %vm511_vm13 = vweird.f32 %v2274_v6  ;;  %v745_v46 = vand.u32 2147483647, %v2280_v56 }
 0x271   :  { %v1530_v8 = vpop.eup %1529  ;;  %v495_v16 = vadd.f32 %v1526_v31, %v494_v54  ;;  %v747_v43 = vand.u32 2147483648, %v2280_v56  ;;  %vm516_vm15 = vcmp.eq.f32.partialorder %v515_v0, 8.507059e+37 }
 0x272   :  { %v469_v37 = vsel %vm468_vm5, %v1524_v24, %v465_v30  ;;  %v507_v62 = vmul.f32 %v1530_v8, %v2274_v6  ;;  %v2307_v19 = vpop.xlane.xlu0 %659  ;;  %v695_v41 = vadd.f32 %v1528_v51, %v694_v15  ;;  %vm512_vm12 = vweird.f32 %v1530_v8 }
 0x273   :  { %v474_v4 = vsel %vm2287_vm2, %v473_v36, %v469_v37  ;;  %v2318_v24 = vpop.xlane.xlu2 %653  ;;  %v499_v59 = vsel %vm498_vm9, %v1526_v31, %v495_v16  ;;  %v1532_v2 = vpop.eup %1531  ;;  %1533 = vrcp.f32 %v2307_v19  ;;  %vm513_vm14 = vmor %vm511_vm13, %vm512_vm12  ;;  %v717_v32 = vand.u32 2147483648, %v2307_v19 }
 0x274   :  { %v525_v61 = vmul.f32 %v2126_v58, %v474_v4  ;;  %v508_v38 = vsub.f32 1.0, %v507_v62  ;;  %v504_v25 = vsel %vm2301_vm6, %v503_v45, %v499_v59  ;;  %v2328_v33 = vpop.xlane.xlu1 %674  ;;  %v699_v31 = vsel %vm698_vm11, %v1528_v51, %v695_v41 }
 0x275   :  { %v527_v58 = vmul.f32 %v2124_v55, %v504_v25  ;;  %v737_v21 = vmul.f32 %v1532_v2, %v2280_v56  ;;  %v704_v23 = vsel %vm2313_vm10, %v703_v49, %v699_v31  ;;  %1535 = vrcp.f32 %v2328_v33 }
 0x276   :  { %1360 = vst.msk [vmem:[#allocation9 + $0x20] sm:$0xff] %vm80_vm0, %v525_v61  ;;  %v509_v47 = vmul.f32 %v1530_v8, %v508_v38  ;;  %v797_v50 = vmul.f32 %v2129_v17, %v704_v23  ;;  %v518_v55 = vor.u32 1.1754944e-38, %v517_v29  ;;  %vm742_vm1 = vweird.f32 %v1532_v2 }
 0x277   :  { %1362 = vst.msk [vmem:[#allocation9 + $0x30] sm:$0xff] %vm80_vm0, %v527_v58  ;;  %v738_v22 = vsub.f32 1.0, %v737_v21  ;;  %v715_v51 = vand.u32 2147483647, %v2307_v19  ;;  %1537 = vrcp.f32 %v2318_v24  ;;  %vm741_vm2 = vweird.f32 %v2280_v56 }
 0x278   :  { %v510_v14 = vadd.f32 %v1530_v8, %v509_v47  ;;  %1365 = vst.msk [vmem:[#allocation9 + $0x48] sm:$0xff] %vm80_vm0, %v797_v50  ;;  %vm2349_vm3 = vcmp.eq.f32.partialorder %v745_v46, 8.507059e+37  ;;  %v748_v52 = vor.u32 1.1754944e-38, %v747_v43  ;;  %vm743_vm4 = vmor %vm741_vm2, %vm742_vm1  ;;  %vm711_vm5 = vweird.f32 %v2307_v19 }
 0x279   :  { %v739_v44 = vmul.f32 %v1532_v2, %v738_v22  ;;  %v1534_v3 = vpop.eup %1533  ;;  %vm2359_vm6 = vcmp.eq.f32.partialorder %v715_v51, 8.507059e+37  ;;  %v790_v56 = vand.u32 2147483647, %v2328_v33  ;;  %v718_v13 = vor.u32 1.1754944e-38, %v717_v32 }
 0x27a   :  { %v514_v6 = vsel %vm513_vm14, %v1530_v8, %v510_v14  ;;  %v2346_v17 = vpop.xlane.xlu0 %668  ;;  %v707_v30 = vmul.f32 %v1534_v3, %v2307_v19  ;;  %v792_v45 = vand.u32 2147483648, %v2328_v33  ;;  %vm786_vm7 = vweird.f32 %v2328_v33 }
 0x27b   :  { %v519_v34 = vsel %vm516_vm15, %v518_v55, %v514_v6  ;;  %v2353_v11 = vpop.xlane.xlu2 %662  ;;  %v740_v39 = vadd.f32 %v1532_v2, %v739_v44  ;;  %1539 = vrcp.f32 %v2346_v17  ;;  %v1536_v10 = vpop.eup %1535  ;;  %vm681_vm8 = vweird.f32 %v2318_v24 }
 0x27c   :  { %v528_v36 = vmul.f32 %v2140_v42, %v519_v34  ;;  %v708_v8 = vsub.f32 1.0, %v707_v30  ;;  %v782_v16 = vmul.f32 %v1536_v10, %v2328_v33  ;;  %vm712_vm9 = vweird.f32 %v1534_v3  ;;  %v2374_v49 = vpop.xlane.xlu1 %934 }
 0x27d   :  { %v744_v42 = vsel %vm743_vm4, %v1532_v2, %v740_v39  ;;  %v1538_v15 = vpop.eup %1537  ;;  %v685_v5 = vand.u32 2147483647, %v2318_v24  ;;  %vm2376_vm10 = vcmp.eq.f32.partialorder %v790_v56, 8.507059e+37  ;;  %1541 = vrcp.f32 %v2353_v11  ;;  %vm713_vm11 = vmor %vm711_vm5, %vm712_vm9 }
 0x27e   :  { %1363 = vst.msk [vmem:[#allocation9 + $0x38] sm:$0xff] %vm80_vm0, %v528_v36  ;;  %v749_v37 = vsel %vm2349_vm3, %v748_v52, %v744_v42  ;;  %v709_v4 = vmul.f32 %v1534_v3, %v708_v8  ;;  %v783_v0 = vsub.f32 1.0, %v782_v16  ;;  %v677_v59 = vmul.f32 %v1538_v15, %v2318_v24 }
 0x27f   :  { %v800_v62 = vmul.f32 %v2143_v48, %v749_v37  ;;  %v793_v38 = vor.u32 1.1754944e-38, %v792_v45  ;;  %v687_v48 = vand.u32 2147483648, %v2318_v24  ;;  %v760_v2 = vand.u32 2147483647, %v2346_v17 }
 0x280   :  { %v710_v41 = vadd.f32 %v1534_v3, %v709_v4  ;;  %v784_v58 = vmul.f32 %v1536_v10, %v783_v0  ;;  %vm787_vm12 = vweird.f32 %v1536_v10  ;;  %v678_v31 = vsub.f32 1.0, %v677_v59 }
 0x281   :  { %1368 = vst.msk [vmem:[#allocation9 + $0x60] sm:$0xff] %vm80_vm0, %v800_v62  ;;  %v1540_v29 = vpop.eup %1539  ;;  %1543 = vrcp.f32 %v2374_v49  ;;  %vm2392_vm13 = vcmp.eq.f32.partialorder %v685_v5, 8.507059e+37  ;;  %v762_v43 = vand.u32 2147483648, %v2346_v17  ;;  %vm682_vm14 = vweird.f32 %v1538_v15  ;;  %vm788_vm15 = vmor %vm786_vm7, %vm787_vm12 }
 0x282   :  { %v2385_v25 = vpop.xlane.xlu0 %928  ;;  %v714_v21 = vsel %vm713_vm11, %v1534_v3, %v710_v41  ;;  %v752_v46 = vmul.f32 %v1540_v29, %v2346_v17  ;;  %v785_v50 = vadd.f32 %v1536_v10, %v784_v58  ;;  %v679_v14 = vmul.f32 %v1538_v15, %v678_v31  ;;  %vm683_vm3 = vmor %vm681_vm8, %vm682_vm14 }
 0x283   :  { %v2390_v47 = vpop.xlane.xlu2 %671  ;;  %v719_v19 = vsel %vm2359_vm6, %v718_v13, %v714_v21  ;;  %v688_v55 = vor.u32 1.1754944e-38, %v687_v48  ;;  %vm756_vm1 = vweird.f32 %v2346_v17  ;;  %v1542_v6 = vpop.eup %1541  ;;  %vm2404_vm2 = vcmp.eq.f32.partialorder %v760_v2, 8.507059e+37 }
 0x284   :  { %v798_v22 = vmul.f32 %v2151_v9, %v719_v19  ;;  %v753_v51 = vsub.f32 1.0, %v752_v46  ;;  %v789_v44 = vsel %vm788_vm15, %v1536_v10, %v785_v50  ;;  %v680_v32 = vadd.f32 %v1538_v15, %v679_v14  ;;  %v2426_v13 = vpop.xlane.xlu1 %943 }
 0x285   :  { %1545 = vrcp.f32 %v2385_v25  ;;  %v794_v9 = vsel %vm2376_vm10, %v793_v38, %v789_v44  ;;  %vm757_vm4 = vweird.f32 %v1540_v29  ;;  %v722_v34 = vmul.f32 %v1542_v6, %v2353_v11 }
 0x286   :  { %1366 = vst.msk [vmem:[#allocation9 + $0x50] sm:$0xff] %vm80_vm0, %v798_v22  ;;  %v754_v33 = vmul.f32 %v1540_v29, %v753_v51  ;;  %v803_v36 = vmul.f32 %v2154_v63, %v794_v9  ;;  %v684_v39 = vsel %vm683_vm3, %v1538_v15, %v680_v32  ;;  %v763_v52 = vor.u32 1.1754944e-38, %v762_v43  ;;  %vm758_vm5 = vmor %vm756_vm1, %vm757_vm4 }
 0x287   :  { %v1544_v1 = vpop.eup %1543  ;;  %v730_v30 = vand.u32 2147483647, %v2353_v11  ;;  %v689_v54 = vsel %vm2392_vm13, %v688_v55, %v684_v39  ;;  %v723_v10 = vsub.f32 1.0, %v722_v34  ;;  %vm727_vm6 = vweird.f32 %v1542_v6 }
 0x288   :  { %v755_v56 = vadd.f32 %v1540_v29, %v754_v33  ;;  %v982_v42 = vmul.f32 %v1544_v1, %v2374_v49  ;;  %1371 = vst.msk [vmem:[#allocation9 + $0x78] sm:$0xff] %vm80_vm0, %v803_v36  ;;  %v796_v24 = vmul.f32 %v2157_v7, %v689_v54  ;;  %v732_v63 = vand.u32 2147483648, %v2353_v11 }
 0x289   :  { %v990_v8 = vand.u32 2147483647, %v2374_v49  ;;  %v724_v37 = vmul.f32 %v1542_v6, %v723_v10  ;;  %1547 = vrcp.f32 %v2390_v47  ;;  %vm726_vm7 = vweird.f32 %v2353_v11 }
 0x28a   :  { %v759_v45 = vsel %vm758_vm5, %v1540_v29, %v755_v56  ;;  %v983_v16 = vsub.f32 1.0, %v982_v42  ;;  %v2429_v15 = vpop.xlane.xlu0 %937  ;;  %1364 = vst.msk [vmem:[#allocation9 + $0x40] sm:$0xff] %vm80_vm0, %v796_v24  ;;  %vm987_vm8 = vweird.f32 %v1544_v1  ;;  %v992_v4 = vand.u32 2147483648, %v2374_v49  ;;  %vm728_vm9 = vmor %vm726_vm7, %vm727_vm6 }
 0x28b   :  { %v1546_v7 = vpop.eup %1545  ;;  %v764_v17 = vsel %vm2404_vm2, %v763_v52, %v759_v45  ;;  %v725_v0 = vadd.f32 %v1542_v6, %v724_v37  ;;  %vm731_vm10 = vcmp.eq.f32.partialorder %v730_v30, 8.507059e+37  ;;  %v733_v41 = vor.u32 1.1754944e-38, %v732_v63 }
 0x28c   :  { %v2431_v62 = vpop.xlane.xlu2 %931  ;;  %v801_v5 = vmul.f32 %v2165_v40, %v764_v17  ;;  %v984_v61 = vmul.f32 %v1544_v1, %v983_v16  ;;  %v952_v59 = vmul.f32 %v1546_v7, %v2385_v25  ;;  %vm986_vm11 = vweird.f32 %v2374_v49 }
 0x28d   :  { %1549 = vrcp.f32 %v2426_v13  ;;  %v729_v11 = vsel %vm728_vm9, %v1542_v6, %v725_v0  ;;  %vm991_vm12 = vcmp.eq.f32.partialorder %v990_v8, 8.507059e+37  ;;  %vm988_vm13 = vmor %vm986_vm11, %vm987_vm8  ;;  %v993_v40 = vor.u32 1.1754944e-38, %v992_v4 }
 0x28e   :  { %1369 = vst.msk [vmem:[#allocation9 + $0x68] sm:$0xff] %vm80_vm0, %v801_v5  ;;  %v985_v38 = vadd.f32 %v1544_v1, %v984_v61  ;;  %v953_v48 = vsub.f32 1.0, %v952_v59  ;;  %v734_v2 = vsel %vm731_vm10, %v733_v41, %v729_v11  ;;  %v960_v29 = vand.u32 2147483647, %v2385_v25 }
 0x28f   :  { %v962_v58 = vand.u32 2147483648, %v2385_v25  ;;  %v1548_v31 = vpop.eup %1547  ;;  %v799_v21 = vmul.f32 %v2170_v27, %v734_v2  ;;  %vm957_vm14 = vweird.f32 %v1546_v7  ;;  %vm956_vm15 = vweird.f32 %v2385_v25 }
 0x290   :  { %v989_v49 = vsel %vm988_vm13, %v1544_v1, %v985_v38  ;;  %v954_v23 = vmul.f32 %v1546_v7, %v953_v48  ;;  %v767_v43 = vmul.f32 %v1548_v31, %v2390_v47  ;;  %1551 = vrcp.f32 %v2429_v15  ;;  %vm958_vm1 = vmor %vm956_vm15, %vm957_vm14 }
 0x291   :  { %v994_v46 = vsel %vm991_vm12, %v993_v40, %v989_v49  ;;  %1367 = vst.msk [vmem:[#allocation9 + $0x58] sm:$0xff] %vm80_vm0, %v799_v21  ;;  %vm961_vm2 = vcmp.eq.f32.partialorder %v960_v29, 8.507059e+37  ;;  %v963_v27 = vor.u32 1.1754944e-38, %v962_v58  ;;  %v777_v6 = vand.u32 2147483648, %v2390_v47 }
 0x292   :  { %v1073_v19 = vmul.f32 %v2174_v26, %v994_v46  ;;  %v955_v50 = vadd.f32 %v1546_v7, %v954_v23  ;;  %v768_v55 = vsub.f32 1.0, %v767_v43  ;;  %1553 = vrcp.f32 %v2431_v62  ;;  %v2459_v26 = vpop.xlane.xlu0 %946 }
 0x293   :  { %v1550_v22 = vpop.eup %1549  ;;  %vm772_vm3 = vweird.f32 %v1548_v31  ;;  %v775_v3 = vand.u32 2147483647, %v2390_v47  ;;  %v1035_v34 = vand.u32 2147483647, %v2426_v13  ;;  %vm771_vm4 = vweird.f32 %v2390_v47 }
 0x294   :  { %v2453_v14 = vpop.xlane.xlu2 %940  ;;  %1374 = vst.msk [vmem:[#allocation9 + $0x90] sm:$0xff] %vm80_vm0, %v1073_v19  ;;  %v959_v51 = vsel %vm958_vm1, %v1546_v7, %v955_v50  ;;  %v1027_v44 = vmul.f32 %v1550_v22, %v2426_v13  ;;  %v769_v32 = vmul.f32 %v1548_v31, %v768_v55  ;;  %v1037_v36 = vand.u32 2147483648, %v2426_v13  ;;  %vm773_vm5 = vmor %vm771_vm4, %vm772_vm3 }
 0x295   :  { %v964_v25 = vsel %vm961_vm2, %v963_v27, %v959_v51  ;;  %1555 = vrcp.f32 %v2459_v26  ;;  %v778_v52 = vor.u32 1.1754944e-38, %v777_v6  ;;  %vm1032_vm6 = vweird.f32 %v1550_v22 }
 0x296   :  { %v1071_v9 = vmul.f32 %v2180_v57, %v964_v25  ;;  %v1028_v33 = vsub.f32 1.0, %v1027_v44  ;;  %v770_v1 = vadd.f32 %v1548_v31, %v769_v32  ;;  %v1552_v39 = vpop.eup %1551  ;;  %vm776_vm7 = vcmp.eq.f32.partialorder %v775_v3, 8.507059e+37 }
 0x297   :  { %vm1031_vm8 = vweird.f32 %v2426_v13  ;;  %v997_v57 = vmul.f32 %v1552_v39, %v2429_v15  ;;  %vm1036_vm9 = vcmp.eq.f32.partialorder %v1035_v34, 8.507059e+37  ;;  %v1005_v42 = vand.u32 2147483647, %v2429_v15  ;;  %v1593_v34 = vld [vmem:[#allocation2] sm:$0xf] }
 0x298   :  { %1372 = vst.msk [vmem:[#allocation9 + $0x80] sm:$0xff] %vm80_vm0, %v1071_v9  ;;  %v1029_v30 = vmul.f32 %v1550_v22, %v1028_v33  ;;  %v774_v54 = vsel %vm773_vm5, %v1548_v31, %v770_v1  ;;  %v1554_v56 = vpop.eup %1553  ;;  %vm1033_vm10 = vmor %vm1031_vm8, %vm1032_vm6  ;;  %v1038_v45 = vor.u32 1.1754944e-38, %v1037_v36  ;;  %vm1001_vm11 = vweird.f32 %v2429_v15 }
 0x299   :  { %v779_v10 = vsel %vm776_vm7, %v778_v52, %v774_v54  ;;  %v998_v37 = vsub.f32 1.0, %v997_v57  ;;  %v967_v16 = vmul.f32 %v1554_v56, %v2431_v62  ;;  %v1007_v7 = vand.u32 2147483648, %v2429_v15 }
 0x29a   :  { %v1030_v47 = vadd.f32 %v1550_v22, %v1029_v30  ;;  %v802_v8 = vmul.f32 %v2184_v53, %v779_v10  ;;  %1557 = vrcp.f32 %v2453_v14  ;;  %vm1002_vm12 = vweird.f32 %v1552_v39 }
 0x29b   :  { %v1556_v17 = vpop.eup %1555  ;;  %v999_v5 = vmul.f32 %v1552_v39, %v998_v37  ;;  %v968_v0 = vsub.f32 1.0, %v967_v16  ;;  %vm2482_vm13 = vcmp.eq.f32.partialorder %v1005_v42, 8.507059e+37  ;;  %v977_v59 = vand.u32 2147483648, %v2431_v62  ;;  %vm1003_vm15 = vmor %vm1001_vm11, %vm1002_vm12 }
 0x29c   :  { %v2471_v24 = vpop.permute.xlu1 %1098  ;;  %v2473_v63 = vpop.xlane.xlu2 %949  ;;  %v1034_v13 = vsel %vm1033_vm10, %v1550_v22, %v1030_v47  ;;  %1370 = vst.msk [vmem:[#allocation9 + $0x70] sm:$0xff] %vm80_vm0, %v802_v8  ;;  %v1042_v41 = vmul.f32 %v1556_v17, %v2459_v26  ;;  %vm972_vm14 = vweird.f32 %v1554_v56  ;;  %v975_v48 = vand.u32 2147483647, %v2431_v62 }
 0x29d   :  { %v1039_v4 = vsel %vm1036_vm9, %v1038_v45, %v1034_v13  ;;  %v1000_v11 = vadd.f32 %v1552_v39, %v999_v5  ;;  %v969_v38 = vmul.f32 %v1554_v56, %v968_v0  ;;  %v1008_v2 = vor.u32 1.1754944e-38, %v1007_v7 }
 0x29e   :  { %v1076_v53 = vmul.f32 %v2188_v60, %v1039_v4  ;;  %vm971_vm1 = vweird.f32 %v2431_v62  ;;  %v1043_v60 = vsub.f32 1.0, %v1042_v41  ;;  %1559 = vrcp.f32 %v2473_v63 }
 0x29f   :  { %v1004_v40 = vsel %vm1003_vm15, %v1552_v39, %v1000_v11  ;;  %v970_v29 = vadd.f32 %v1554_v56, %v969_v38  ;;  %v1050_v58 = vand.u32 2147483647, %v2459_v26  ;;  %v1052_v31 = vand.u32 2147483648, %v2459_v26  ;;  %vm973_vm2 = vmor %vm971_vm1, %vm972_vm14 }
 0x2a0   :  { %1377 = vst.msk [vmem:[#allocation9 + $0xa8] sm:$0xff] %vm80_vm0, %v1076_v53  ;;  %v1558_v21 = vpop.eup %1557  ;;  %v1009_v49 = vsel %vm2482_vm13, %v1008_v2, %v1004_v40  ;;  %v978_v23 = vor.u32 1.1754944e-38, %v977_v59  ;;  %v1044_v15 = vmul.f32 %v1556_v17, %v1043_v60  ;;  %vm1047_vm3 = vweird.f32 %v1556_v17 }
 0x2a1   :  { %v1074_v62 = vmul.f32 %v2194_v12, %v1009_v49  ;;  %v974_v19 = vsel %vm973_vm2, %v1554_v56, %v970_v29  ;;  %vm976_vm4 = vcmp.eq.f32.partialorder %v975_v48, 8.507059e+37  ;;  %v1012_v50 = vmul.f32 %v1558_v21, %v2453_v14 }
 0x2a2   :  { %v979_v27 = vsel %vm976_vm4, %v978_v23, %v974_v19  ;;  %v1045_v55 = vadd.f32 %v1556_v17, %v1044_v15  ;;  %vm1046_vm5 = vweird.f32 %v2459_v26  ;;  %v1053_v6 = vor.u32 1.1754944e-38, %v1052_v31 }
 0x2a3   :  { %1375 = vst.msk [vmem:[#allocation9 + $0x98] sm:$0xff] %vm80_vm0, %v1074_v62  ;;  %v1072_v51 = vmul.f32 %v2199_v28, %v979_v27  ;;  %vm1048_vm6 = vmor %vm1046_vm5, %vm1047_vm3  ;;  %v1013_v44 = vsub.f32 1.0, %v1012_v50  ;;  %vm1051_vm7 = vcmp.eq.f32.partialorder %v1050_v58, 8.507059e+37  ;;  %v1020_v12 = vand.u32 2147483647, %v2453_v14 }
 0x2a4   :  { %v1111_v46 = vpop.permute.xlu1 %1110  ;;  %v2498_v43 = vpop.permute.xlu2 %1106  ;;  %v1049_v32 = vsel %vm1048_vm6, %v1556_v17, %v1045_v55  ;;  %v1022_v3 = vand.u32 2147483648, %v2453_v14  ;;  %vm1017_vm8 = vweird.f32 %v1558_v21  ;;  %v2511_v1 = vperm.slane %v1593_v34, 3 }
 0x2a5   :  { %v2502_v22 = vpop.permute.xlu0 %1102  ;;  %v1560_v25 = vpop.eup %1559  ;;  %1373 = vst.msk [vmem:[#allocation9 + $0x88] sm:$0xff] %vm80_vm0, %v1072_v51  ;;  %v1054_v9 = vsel %vm1051_vm7, %v1053_v6, %v1049_v32  ;;  %v1014_v33 = vmul.f32 %v1558_v21, %v1013_v44  ;;  %vm1016_vm9 = vweird.f32 %v2453_v14  ;;  %vm1021_vm11 = vcmp.eq.f32.partialorder %v1020_v12, 8.507059e+37 }
 0x2a6   :  { %v1057_v26 = vmul.f32 %v1560_v25, %v2473_v63  ;;  %v1077_v28 = vmul.f32 %v2203_v18, %v1054_v9  ;;  %vm1018_vm10 = vmor %vm1016_vm9, %vm1017_vm8  ;;  %v1023_v52 = vor.u32 1.1754944e-38, %v1022_v3  ;;  %v1130_v30 = vmul.f32 %v2511_v1, %v2471_v24 }
 0x2a7   :  { %v1015_v36 = vadd.f32 %v1558_v21, %v1014_v33  ;;  %v1067_v54 = vand.u32 2147483648, %v2473_v63  ;;  %vm1062_vm12 = vweird.f32 %v1560_v25  ;;  %v1065_v18 = vand.u32 2147483647, %v2473_v63 }
 0x2a8   :  { %v1058_v39 = vsub.f32 1.0, %v1057_v26  ;;  %1378 = vst.msk [vmem:[#allocation9 + $0xb0] sm:$0xff] %vm80_vm0, %v1077_v28  ;;  %vm1061_vm13 = vweird.f32 %v2473_v63  ;;  %v1133_v4 = vmul.f32 %v2511_v1, %v1111_v46  ;;  %v1132_v41 = vmul.f32 %v2511_v1, %v2498_v43 }
 0x2a9   :  { %v1019_v10 = vsel %vm1018_vm10, %v1558_v21, %v1015_v36  ;;  %vm1063_vm14 = vmor %vm1061_vm13, %vm1062_vm12  ;;  %v1068_v16 = vor.u32 1.1754944e-38, %v1067_v54  ;;  %vm1066_vm15 = vcmp.eq.f32.partialorder %v1065_v18, 8.507059e+37 }
 0x2aa   :  { %v1059_v47 = vmul.f32 %v1560_v25, %v1058_v39  ;;  %v1024_v14 = vsel %vm1021_vm11, %v1023_v52, %v1019_v10 }
 0x2ab   :  { %v1075_v45 = vmul.f32 %v2208_v35, %v1024_v14 }
 0x2ac   :  { %v1119_v57 = vpop.permute.xlu1 %1118  ;;  %v1115_v56 = vpop.permute.xlu2 %1114  ;;  %v1060_v37 = vadd.f32 %v1560_v25, %v1059_v47 }
 0x2ad   :  { %v1141_v42 = vpop.permute.xlu0 %1140  ;;  %1376 = vst.msk [vmem:[#allocation9 + $0xa0] sm:$0xff] %vm80_vm0, %v1075_v45  ;;  %v1135_v15 = vmul.f32 %v2511_v1, %v1119_v57  ;;  %v1134_v46 = vmul.f32 %v2511_v1, %v1115_v56 }
 0x2ae   :  { %v1178_v8 = vsub.f32 %v1130_v30, %v1141_v42  ;;  %v1064_v13 = vsel %vm1063_vm14, %v1560_v25, %v1060_v37 }
 0x2af   :  { %v1069_v7 = vsel %vm1066_vm15, %v1068_v16, %v1064_v13 }
 0x2b0   :  { %v1186_v24 = vmul.f32 1.442695, %v1178_v8  ;;  %v1078_v17 = vmul.f32 %v2212_v20, %v1069_v7  ;;  %v1131_v20 = vmul.f32 %v2511_v1, %v2502_v22 }
 0x2b2   :  { %1561 = vpow2.f32 %v1186_v24  ;;  %1379 = vst.msk [vmem:[#allocation9 + $0xb8] sm:$0xff] %vm80_vm0, %v1078_v17 }
 0x2b4   :  { %v1127_v5 = vpop.permute.xlu1 %1126  ;;  %v1123_v0 = vpop.permute.xlu2 %1122 }
 0x2b5   :  { %v1156_v35 = vpop.permute.xlu0 %1155  ;;  %v1136_v11 = vmul.f32 %v2511_v1, %v1123_v0  ;;  %v1137_v12 = vmul.f32 %v2511_v1, %v1127_v5 }
 0x2b6   :  { %v1181_v53 = vsub.f32 %v1133_v4, %v1156_v35 }
 0x2b8   :  { %v2526_v63 = vpop.eup %1561  ;;  %v1192_v61 = vmul.f32 1.442695, %v1181_v53 }
 0x2b9   :  { %v1202_v59 = vsel %vm80_vm0, %v2526_v63, 0.0 }
 0x2ba   :  { %1563 = vpow2.f32 %v1192_v61  ;;  %1203 = vadd.xlane.f32.xlu1 %v1202_v59 }
 0x2bc   :  { %v1151_v38 = vpop.permute.xlu1 %1150  ;;  %v1146_v48 = vpop.permute.xlu2 %1145 }
 0x2bd   :  { %v1180_v2 = vsub.f32 %v1132_v41, %v1151_v38  ;;  %v1179_v60 = vsub.f32 %v1131_v20, %v1146_v48  ;;  %v1171_v40 = vpop.permute.xlu0 %1170 }
 0x2be   :  { %v1184_v29 = vsub.f32 %v1136_v11, %v1171_v40 }
 0x2bf   :  { %v1190_v58 = vmul.f32 1.442695, %v1180_v2  ;;  %v1188_v31 = vmul.f32 1.442695, %v1179_v60 }
 0x2c0   :  { %v2535_v21 = vpop.eup %1563  ;;  %v1198_v49 = vmul.f32 1.442695, %v1184_v29 }
 0x2c1   :  { %1565 = vpow2.f32 %v1190_v58  ;;  %v1211_v23 = vsel %vm80_vm0, %v2535_v21, 0.0 }
 0x2c2   :  { %1567 = vpow2.f32 %v1188_v31  ;;  %1212 = vadd.xlane.f32.xlu1 %v1211_v23 }
 0x2c3   :  { %1569 = vpow2.f32 %v1198_v49 }
 0x2c4   :  { %v1166_v43 = vpop.permute.xlu1 %1165  ;;  %v1161_v62 = vpop.permute.xlu2 %1160 }
 0x2c5   :  { %v1183_v19 = vsub.f32 %v1135_v15, %v1166_v43  ;;  %v1182_v50 = vsub.f32 %v1134_v46, %v1161_v62 }
 0x2c7   :  { %v2541_v22 = vpop.eup %1565  ;;  %v1196_v27 = vmul.f32 1.442695, %v1183_v19  ;;  %v1194_v55 = vmul.f32 1.442695, %v1182_v50 }
 0x2c8   :  { %v2543_v51 = vpop.eup %1567  ;;  %v1208_v6 = vsel %vm80_vm0, %v2541_v22, 0.0 }
 0x2c9   :  { %v2547_v44 = vpop.eup %1569  ;;  %1571 = vpow2.f32 %v1196_v27  ;;  %1209 = vadd.xlane.f32.xlu2 %v1208_v6  ;;  %v1205_v25 = vsel %vm80_vm0, %v2543_v51, 0.0 }
 0x2ca   :  { %1573 = vpow2.f32 %v1194_v55  ;;  %1206 = vadd.xlane.f32.xlu0 %v1205_v25  ;;  %v1220_v32 = vsel %vm80_vm0, %v2547_v44, 0.0 }
 0x2cb   :  { %1221 = vadd.xlane.f32.xlu1 %v1220_v32 }
 0x2cc   :  { %v1176_v3 = vpop.permute.xlu2 %1175 }
 0x2cd   :  { %v1185_v9 = vsub.f32 %v1137_v12, %v1176_v3 }
 0x2cf   :  { %v2554_v33 = vpop.eup %1571  ;;  %v1200_v26 = vmul.f32 1.442695, %v1185_v9 }
 0x2d0   :  { %v2556_v34 = vpop.eup %1573  ;;  %v1217_v28 = vsel %vm80_vm0, %v2554_v33, 0.0 }
 0x2d1   :  { %1575 = vpow2.f32 %v1200_v26  ;;  %v1214_v36 = vsel %vm80_vm0, %v2556_v34, 0.0 }
 0x2d2   :  { %1218 = vadd.xlane.f32.xlu0 %v1217_v28  ;;  %1215 = vadd.xlane.f32.xlu2 %v1214_v36 }
 0x2d7   :  { %v2562_v39 = vpop.eup %1575 }
 0x2d8   :  { %v1223_v1 = vsel %vm80_vm0, %v2562_v39, 0.0 }
 0x2da   :  { %1224 = vadd.xlane.f32.xlu2 %v1223_v1 }
 0x32d   :  { %v1204_v52 = vpop.xlane.xlu1 %1203 }
 0x32e   :  { %1577 = vrcp.f32 %v1204_v52  ;;  %v1237_v10 = vand.u32 2147483648, %v1204_v52  ;;  %v1235_v18 = vand.u32 2147483647, %v1204_v52  ;;  %vm1231_vm2 = vweird.f32 %v1204_v52 }
 0x330   :  { %v1238_v8 = vor.u32 1.1754944e-38, %v1237_v10  ;;  %vm1236_vm4 = vcmp.eq.f32.partialorder %v1235_v18, 8.507059e+37 }
 0x334   :  { %v1578_v30 = vpop.eup %1577 }
 0x335   :  { %v1227_v54 = vmul.f32 %v1578_v30, %v1204_v52  ;;  %v1213_v57 = vpop.xlane.xlu1 %1212  ;;  %vm1232_vm1 = vweird.f32 %v1578_v30 }
 0x336   :  { %1579 = vrcp.f32 %v1213_v57  ;;  %vm1233_vm3 = vmor %vm1231_vm2, %vm1232_vm1  ;;  %v1280_v5 = vand.u32 2147483647, %v1213_v57  ;;  %v1282_v0 = vand.u32 2147483648, %v1213_v57  ;;  %vm1276_vm6 = vweird.f32 %v1213_v57 }
 0x337   :  { %v1228_v56 = vsub.f32 1.0, %v1227_v54 }
 0x338   :  { %vm1281_vm8 = vcmp.eq.f32.partialorder %v1280_v5, 8.507059e+37  ;;  %v1283_v41 = vor.u32 1.1754944e-38, %v1282_v0 }
 0x339   :  { %v1229_v47 = vmul.f32 %v1578_v30, %v1228_v56 }
 0x33b   :  { %v1230_v42 = vadd.f32 %v1578_v30, %v1229_v47 }
 0x33c   :  { %v1580_v14 = vpop.eup %1579  ;;  %v2566_v45 = vpop.xlane.xlu2 %1209 }
 0x33d   :  { %v1234_v37 = vsel %vm1233_vm3, %v1578_v30, %v1230_v42  ;;  %v1272_v16 = vmul.f32 %v1580_v14, %v1213_v57  ;;  %v1207_v24 = vpop.xlane.xlu0 %1206  ;;  %1581 = vrcp.f32 %v2566_v45  ;;  %vm1277_vm5 = vweird.f32 %v1580_v14 }
 0x33e   :  { %v1239_v13 = vsel %vm1236_vm4, %v1238_v8, %v1234_v37  ;;  %1583 = vrcp.f32 %v1207_v24  ;;  %v2569_v7 = vpop.xlane.xlu1 %1221  ;;  %vm1278_vm7 = vmor %vm1276_vm6, %vm1277_vm5  ;;  %vm1246_vm9 = vweird.f32 %v1207_v24  ;;  %v1250_v38 = vand.u32 2147483647, %v1207_v24 }
 0x33f   :  { %v1346_v17 = vmul.f32 %v2526_v63, %v1239_v13  ;;  %v1273_v4 = vsub.f32 1.0, %v1272_v16  ;;  %1585 = vrcp.f32 %v2569_v7  ;;  %v1252_v48 = vand.u32 2147483648, %v1207_v24 }
 0x340   :  { %v1265_v31 = vand.u32 2147483647, %v2566_v45  ;;  %v1267_v15 = vand.u32 2147483648, %v2566_v45  ;;  %v1325_v62 = vand.u32 2147483647, %v2569_v7  ;;  %vm1261_vm12 = vweird.f32 %v2566_v45 }
 0x341   :  { %1380 = vst.msk [vmem:[#allocation9 + $0xc0] sm:$0xff] %vm80_vm0, %v1346_v17  ;;  %v1274_v35 = vmul.f32 %v1580_v14, %v1273_v4  ;;  %vm2588_vm13 = vcmp.eq.f32.partialorder %v1250_v38, 8.507059e+37  ;;  %v1253_v27 = vor.u32 1.1754944e-38, %v1252_v48  ;;  %v1327_v6 = vand.u32 2147483648, %v2569_v7 }
 0x342   :  { %v1268_v32 = vor.u32 1.1754944e-38, %v1267_v15  ;;  %vm1266_vm2 = vcmp.eq.f32.partialorder %v1265_v31, 8.507059e+37  ;;  %vm1321_vm3 = vweird.f32 %v2569_v7  ;;  %vm2595_vm4 = vcmp.eq.f32.partialorder %v1325_v62, 8.507059e+37 }
 0x343   :  { %v1582_v53 = vpop.eup %1581  ;;  %v1275_v61 = vadd.f32 %v1580_v14, %v1274_v35  ;;  %v1328_v10 = vor.u32 1.1754944e-38, %v1327_v6 }
 0x344   :  { %v1584_v59 = vpop.eup %1583  ;;  %v1257_v20 = vmul.f32 %v1582_v53, %v2566_v45  ;;  %vm1262_vm10 = vweird.f32 %v1582_v53 }
 0x345   :  { %v1279_v63 = vsel %vm1278_vm7, %v1580_v14, %v1275_v61  ;;  %v1242_v11 = vmul.f32 %v1584_v59, %v1207_v24  ;;  %v2575_v2 = vpop.xlane.xlu0 %1218  ;;  %v2577_v60 = vpop.xlane.xlu2 %1215  ;;  %vm1247_vm11 = vweird.f32 %v1584_v59  ;;  %vm1263_vm14 = vmor %vm1261_vm12, %vm1262_vm10 }
 0x346   :  { %v1586_v40 = vpop.eup %1585  ;;  %v1284_v29 = vsel %vm1281_vm8, %v1283_v41, %v1279_v63  ;;  %v1258_v58 = vsub.f32 1.0, %v1257_v20  ;;  %1587 = vrcp.f32 %v2575_v2  ;;  %vm1248_vm1 = vmor %vm1246_vm9, %vm1247_vm11  ;;  %v1310_v45 = vand.u32 2147483647, %v2575_v2 }
 0x347   :  { %v1349_v49 = vmul.f32 %v2535_v21, %v1284_v29  ;;  %v1243_v23 = vsub.f32 1.0, %v1242_v11  ;;  %v1317_v46 = vmul.f32 %v1586_v40, %v2569_v7  ;;  %1589 = vrcp.f32 %v2577_v60 }
 0x348   :  { %v1259_v43 = vmul.f32 %v1582_v53, %v1258_v58  ;;  %vm1322_vm15 = vweird.f32 %v1586_v40  ;;  %v1312_v37 = vand.u32 2147483648, %v2575_v2  ;;  %vm1306_vm7 = vweird.f32 %v2575_v2 }
 0x349   :  { %1383 = vst.msk [vmem:[#allocation9 + $0xd8] sm:$0xff] %vm80_vm0, %v1349_v49  ;;  %v1244_v19 = vmul.f32 %v1584_v59, %v1243_v23  ;;  %v1318_v50 = vsub.f32 1.0, %v1317_v46  ;;  %vm1323_vm5 = vmor %vm1321_vm3, %vm1322_vm15  ;;  %v1297_v24 = vand.u32 2147483648, %v2577_v60  ;;  %v1295_v17 = vand.u32 2147483647, %v2577_v60 }
 0x34a   :  { %v1260_v55 = vadd.f32 %v1582_v53, %v1259_v43  ;;  %v1313_v5 = vor.u32 1.1754944e-38, %v1312_v37  ;;  %vm1291_vm10 = vweird.f32 %v2577_v60  ;;  %vm1311_vm11 = vcmp.eq.f32.partialorder %v1310_v45, 8.507059e+37 }
 0x34b   :  { %v1245_v25 = vadd.f32 %v1584_v59, %v1244_v19  ;;  %v1319_v12 = vmul.f32 %v1586_v40, %v1318_v50  ;;  %v1298_v61 = vor.u32 1.1754944e-38, %v1297_v24 }
 0x34c   :  { %v1588_v3 = vpop.eup %1587  ;;  %v1264_v9 = vsel %vm1263_vm14, %v1582_v53, %v1260_v55 }
 0x34d   :  { %v1249_v28 = vsel %vm1248_vm1, %v1584_v59, %v1245_v25  ;;  %v1269_v36 = vsel %vm1266_vm2, %v1268_v32, %v1264_v9  ;;  %v1320_v1 = vadd.f32 %v1586_v40, %v1319_v12  ;;  %v1302_v52 = vmul.f32 %v1588_v3, %v2575_v2  ;;  %v1225_v30 = vpop.xlane.xlu2 %1224  ;;  %v1590_v54 = vpop.eup %1589 }
 0x34e   :  { %v1254_v57 = vsel %vm2588_vm13, %v1253_v27, %v1249_v28  ;;  %v1348_v56 = vmul.f32 %v2541_v22, %v1269_v36  ;;  %1591 = vrcp.f32 %v1225_v30  ;;  %v1287_v14 = vmul.f32 %v1590_v54, %v2577_v60 }
 0x34f   :  { %v1347_v47 = vmul.f32 %v2543_v51, %v1254_v57  ;;  %v1324_v18 = vsel %vm1323_vm5, %v1586_v40, %v1320_v1  ;;  %v1303_v42 = vsub.f32 1.0, %v1302_v52  ;;  %vm1307_vm6 = vweird.f32 %v1588_v3 }
 0x350   :  { %1382 = vst.msk [vmem:[#allocation9 + $0xd0] sm:$0xff] %vm80_vm0, %v1348_v56  ;;  %v1329_v8 = vsel %vm2595_vm4, %v1328_v10, %v1324_v18  ;;  %v1288_v51 = vsub.f32 1.0, %v1287_v14  ;;  %vm1292_vm8 = vweird.f32 %v1590_v54  ;;  %vm1308_vm9 = vmor %vm1306_vm7, %vm1307_vm6  ;;  %vm1296_vm13 = vcmp.eq.f32.partialorder %v1295_v17, 8.507059e+37 }
 0x351   :  { %1381 = vst.msk [vmem:[#allocation9 + $0xc8] sm:$0xff] %vm80_vm0, %v1347_v47  ;;  %v1352_v22 = vmul.f32 %v2547_v44, %v1329_v8  ;;  %v1304_v16 = vmul.f32 %v1588_v3, %v1303_v42  ;;  %vm1293_vm12 = vmor %vm1291_vm10, %vm1292_vm8  ;;  %v1342_v11 = vand.u32 2147483648, %v1225_v30  ;;  %v1340_v2 = vand.u32 2147483647, %v1225_v30 }
 0x352   :  { %v1289_v7 = vmul.f32 %v1590_v54, %v1288_v51  ;;  %vm1336_vm15 = vweird.f32 %v1225_v30 }
 0x353   :  { %1386 = vst.msk [vmem:[#allocation9 + $0xf0] sm:$0xff] %vm80_vm0, %v1352_v22  ;;  %v1305_v13 = vadd.f32 %v1588_v3, %v1304_v16  ;;  %v1343_v40 = vor.u32 1.1754944e-38, %v1342_v11  ;;  %vm1341_vm2 = vcmp.eq.f32.partialorder %v1340_v2, 8.507059e+37 }
 0x354   :  { %v1592_v4 = vpop.eup %1591  ;;  %v1290_v0 = vadd.f32 %v1590_v54, %v1289_v7 }
 0x355   :  { %v1309_v44 = vsel %vm1308_vm9, %v1588_v3, %v1305_v13  ;;  %v1332_v35 = vmul.f32 %v1592_v4, %v1225_v30  ;;  %vm1337_vm14 = vweird.f32 %v1592_v4 }
 0x356   :  { %v1314_v53 = vsel %vm1311_vm11, %v1313_v5, %v1309_v44  ;;  %v1294_v41 = vsel %vm1293_vm12, %v1590_v54, %v1290_v0  ;;  %vm1338_vm1 = vmor %vm1336_vm15, %vm1337_vm14 }
 0x357   :  { %v1351_v59 = vmul.f32 %v2554_v33, %v1314_v53  ;;  %v1333_v20 = vsub.f32 1.0, %v1332_v35  ;;  %v1299_v63 = vsel %vm1296_vm13, %v1298_v61, %v1294_v41 }
 0x358   :  { %v1350_v38 = vmul.f32 %v2556_v34, %v1299_v63 }
 0x359   :  { %1385 = vst.msk [vmem:[#allocation9 + $0xe8] sm:$0xff] %vm80_vm0, %v1351_v59  ;;  %v1334_v48 = vmul.f32 %v1592_v4, %v1333_v20 }
 0x35a   :  { %1384 = vst.msk [vmem:[#allocation9 + $0xe0] sm:$0xff] %vm80_vm0, %v1350_v38 }
 0x35b   :  { %v1335_v60 = vadd.f32 %v1592_v4, %v1334_v48 }
 0x35d   :  { %v1339_v33 = vsel %vm1338_vm1, %v1592_v4, %v1335_v60 }
 0x35e   :  { %v1344_v29 = vsel %vm1341_vm2, %v1343_v40, %v1339_v33 }
 0x35f   :  { %v1353_v34 = vmul.f32 %v2562_v39, %v1344_v29 }
 0x361   :  { %1387 = vst.msk [vmem:[#allocation9 + $0xf8] sm:$0xff] %vm80_vm0, %v1353_v34 }
 0x362   :  { %1400 = dma.vmem_to_hbm [thread:$0]  %s1393_s18, 4096, %s1395_s21, [#allocation5], %s1699_s11, %s1699_s11, %s1700_s12  }
 0x363   :  { %1694 = dma.done.wait [#allocation5], 4096  }
 0x364   :  { %1695 = vsyncadd [#allocation5], 4294963200 }
 0x365   :  { %1405 = vsyncpa [#allocation4], 1 }
 0x366   :  { %1406 = vsyncpa [#allocation7], 1 }
 0x367   :  { %1407 = vsyncpa [#allocation5], 1 }

</bundles_post_ra>
